<compile_context>
chip_gen: v6e
topology: v6e:2x2x1
jax: 0.10.0
libtpu: 0.0.40
codegen_flags: <defaults>
</compile_context>

<pallas_src>
import jax
import jax.numpy as jnp
from jax import lax
from jax.experimental import pallas as pl
from jax.experimental.pallas import tpu as pltpu

# ---- small config consistent with the module structure (scaled-down BERT) ----
HIDDEN = 32          # bert hidden size (scaled down from 768)
NUM_LAYERS = 2       # bert layers (scaled down from 12)
NUM_HEADS = 2        # attention heads (scaled down from 12)
HEAD_DIM = HIDDEN // NUM_HEADS
INTERMEDIATE = 64    # FFN intermediate (scaled down from 3072)
SEQ = 8
BATCH = 2
VOCAB = 50
TYPE_VOCAB = 2
MAX_POS = 16
NUM_LABELS = 9       # num_labels=9, multi_label_classification -> BCEWithLogits
REL_VOCAB = 825      # GraphEncoder rel_embedding
PAT_VOCAB = 10       # GraphEncoder pattern_embedding
GAT_HEADS = 4        # MultiHeadGATLayer(in, out, 4)
LN_EPS = 1e-12


def _full_spec(shape):
    """BlockSpec covering the full array (single block, any grid arity)."""
    return pl.BlockSpec(shape, lambda *_: (0,) * len(shape))


# ---------------------------------------------------------------------------
# Fused BERT encoder kernel: one grid step = one batch example, all layers.
# ---------------------------------------------------------------------------
def _bert_encoder_kernel(x_ref, mask_ref, eg_ref, eb_ref,
                         qkv_w_ref, qkv_b_ref, o_w_ref, o_b_ref,
                         ln1_g_ref, ln1_b_ref, i_w_ref, i_b_ref,
                         f_w_ref, f_b_ref, ln2_g_ref, ln2_b_ref,
                         pool_w_ref, pool_b_ref, cls_w_ref, cls_b_ref,
                         logits_ref):
    def ln(x, g, b):
        mu = jnp.mean(x, axis=-1, keepdims=True)
        var = jnp.mean((x - mu) ** 2, axis=-1, keepdims=True)
        return (x - mu) * lax.rsqrt(var + LN_EPS) * g + b

    def gelu(x):  # exact (erf) GELU, as in BERT
        return 0.5 * x * (1.0 + lax.erf(x * 0.7071067811865476))

    x = ln(x_ref[0].astype(jnp.float32), eg_ref[...], eb_ref[...])        # [S, H]
    m = mask_ref[0].astype(jnp.float32)                                   # [1, S] additive mask
    scale = jnp.float32(1.0 / (HEAD_DIM ** 0.5))

    for l in range(NUM_LAYERS):                 # static unroll (NUM_LAYERS=2)
        # ---- self-attention (fused QKV projection, heads sliced on lanes) ----
        qkv = jnp.dot(x, qkv_w_ref[l], preferred_element_type=jnp.float32) + qkv_b_ref[l]
        ctx_heads = []
        for h in range(NUM_HEADS):
            qh = qkv[:, h * HEAD_DIM:(h + 1) * HEAD_DIM]
            kh = qkv[:, HIDDEN + h * HEAD_DIM:HIDDEN + (h + 1) * HEAD_DIM]
            vh = qkv[:, 2 * HIDDEN + h * HEAD_DIM:2 * HIDDEN + (h + 1) * HEAD_DIM]
            s = jnp.dot(qh, kh.T, preferred_element_type=jnp.float32) * scale + m
            s = s - jnp.max(s, axis=-1, keepdims=True)
            p = jnp.exp(s)
            p = p * pl.reciprocal(jnp.sum(p, axis=-1, keepdims=True), approx=False)
            ctx_heads.append(jnp.dot(p, vh, preferred_element_type=jnp.float32))
        ctx = jnp.concatenate(ctx_heads, axis=-1)                         # [S, H]
        attn_out = jnp.dot(ctx, o_w_ref[l], preferred_element_type=jnp.float32) + o_b_ref[l]
        x = ln(attn_out + x, ln1_g_ref[l], ln1_b_ref[l])                  # residual + LN1
        # ---- FFN ----
        hmid = gelu(jnp.dot(x, i_w_ref[l], preferred_element_type=jnp.float32) + i_b_ref[l])
        out = jnp.dot(hmid, f_w_ref[l], preferred_element_type=jnp.float32) + f_b_ref[l]
        x = ln(out + x, ln2_g_ref[l], ln2_b_ref[l])                       # residual + LN2

    # ---- pooler (CLS token) + classifier ----
    pooled = jnp.tanh(jnp.dot(x[0:1, :], pool_w_ref[...],
                              preferred_element_type=jnp.float32) + pool_b_ref[...])
    logits = jnp.dot(pooled, cls_w_ref[...],
                     preferred_element_type=jnp.float32) + cls_b_ref[...]
    logits_ref[0] = logits


def bert_encoder(params, x_emb, add_mask):
    """x_emb: [B, S, H] (token+pos+type sums, f32); add_mask: [B, 1, S] additive."""
    L3 = 3 * HIDDEN

    def rep(shape):          # weight block: same full block at every grid step
        return pl.BlockSpec(shape, lambda b: (0,) * len(shape))

    logits = pl.pallas_call(
        _bert_encoder_kernel,
        out_shape=jax.ShapeDtypeStruct((BATCH, 1, NUM_LABELS), jnp.float32),
        grid=(BATCH,),
        in_specs=[
            pl.BlockSpec((1, SEQ, HIDDEN), lambda b: (b, 0, 0)),
            pl.BlockSpec((1, 1, SEQ), lambda b: (b, 0, 0)),
            rep((1, HIDDEN)), rep((1, HIDDEN)),
            rep((NUM_LAYERS, HIDDEN, L3)), rep((NUM_LAYERS, 1, L3)),
            rep((NUM_LAYERS, HIDDEN, HIDDEN)), rep((NUM_LAYERS, 1, HIDDEN)),
            rep((NUM_LAYERS, 1, HIDDEN)), rep((NUM_LAYERS, 1, HIDDEN)),
            rep((NUM_LAYERS, HIDDEN, INTERMEDIATE)), rep((NUM_LAYERS, 1, INTERMEDIATE)),
            rep((NUM_LAYERS, INTERMEDIATE, HIDDEN)), rep((NUM_LAYERS, 1, HIDDEN)),
            rep((NUM_LAYERS, 1, HIDDEN)), rep((NUM_LAYERS, 1, HIDDEN)),
            rep((HIDDEN, HIDDEN)), rep((1, HIDDEN)),
            rep((HIDDEN, NUM_LABELS)), rep((1, NUM_LABELS)),
        ],
        out_specs=pl.BlockSpec((1, 1, NUM_LABELS), lambda b: (b, 0, 0)),
        compiler_params=pltpu.CompilerParams(dimension_semantics=("parallel",)),
    )(x_emb, add_mask,
      params["emb_ln_g"], params["emb_ln_b"],
      params["qkv_w"], params["qkv_b"], params["o_w"], params["o_b"],
      params["ln1_g"], params["ln1_b"], params["i_w"], params["i_b"],
      params["f_w"], params["f_b"], params["ln2_g"], params["ln2_b"],
      params["pool_w"], params["pool_b"], params["cls_w"], params["cls_b"])
    return logits[:, 0, :]                                                # [B, NUM_LABELS]


# ---------------------------------------------------------------------------
# Batched GAT edge kernel: all 4 heads in one call, 128-lane-wide matmuls.
# ---------------------------------------------------------------------------
def _gat_kernel(src_ref, dst_ref, pat_ref, wfc_ref, wa1_ref, wa2_ref, z1_ref, e_ref):
    # ConvAT.edge_attention for all heads:
    #   z1_h = fc_h(src*p); dst_h = fc_h(dst); a_h = attn_fc_h([z1_h, dst_h]); e_h = leaky_relu(a_h)
    sp = src_ref[...] * pat_ref[...]
    z1 = jnp.dot(sp, wfc_ref[...], preferred_element_type=jnp.float32)     # [E, 4H] (128 lanes)
    zd = jnp.dot(dst_ref[...], wfc_ref[...], preferred_element_type=jnp.float32)
    a = z1 * wa1_ref[...] + zd * wa2_ref[...]                              # [E, 4H]
    cols = []
    for h in range(GAT_HEADS):                                             # VPU lane reductions
        cols.append(jnp.sum(a[:, h * HIDDEN:(h + 1) * HIDDEN], axis=-1, keepdims=True))
    e = jnp.concatenate(cols, axis=-1)                                     # [E, GAT_HEADS]
    z1_ref[...] = z1
    e_ref[...] = jnp.where(e > 0, e, 0.01 * e)                             # leaky_relu slope 0.01


def gat_edges(src_h, dst_h, pat, wfc_cat, wa1_cat, wa2_cat):
    E, H = src_h.shape
    HO = wfc_cat.shape[1]                                                  # 4*HIDDEN = 128
    return pl.pallas_call(
        _gat_kernel,
        out_shape=(jax.ShapeDtypeStruct((E, HO), jnp.float32),
                   jax.ShapeDtypeStruct((E, GAT_HEADS), jnp.float32)),
        grid=(1,),
        in_specs=[_full_spec((E, H)), _full_spec((E, H)), _full_spec((E, H)),
                  _full_spec((H, HO)), _full_spec((1, HO)), _full_spec((1, HO))],
        out_specs=(_full_spec((E, HO)), _full_spec((E, GAT_HEADS))),
    )(src_h, dst_h, pat, wfc_cat, wa1_cat, wa2_cat)


# ---------------------------------------------------------------------------
# Parameters
# ---------------------------------------------------------------------------
def init_params(key):
    keys = jax.random.split(key, 64)
    kit = iter(keys)

    def w(shape):
        return jax.random.normal(next(kit), shape, dtype=jnp.float32) * 0.02

    params = {
        "tok_emb": w((VOCAB, HIDDEN)),
        "pos_emb": w((MAX_POS, HIDDEN)),
        "type_emb": w((TYPE_VOCAB, HIDDEN)),
        "emb_ln_g": jnp.ones((1, HIDDEN), jnp.float32),
        "emb_ln_b": jnp.zeros((1, HIDDEN), jnp.float32),
        "pool_w": w((HIDDEN, HIDDEN)), "pool_b": jnp.zeros((1, HIDDEN), jnp.float32),
        "cls_w": w((HIDDEN, NUM_LABELS)), "cls_b": jnp.zeros((1, NUM_LABELS), jnp.float32),
        # GraphEncoder embeddings: nn.init.constant_(weight, 0.0) per the module __init__
        "rel_emb": jnp.zeros((REL_VOCAB, HIDDEN), jnp.float32),
        "pat_emb": jnp.zeros((PAT_VOCAB, HIDDEN), jnp.float32),
    }

    # stacked BERT layer weights (QKV fused into one [H, 3H] matrix per layer)
    qkv_w, qkv_b, o_w, o_b = [], [], [], []
    ln1_g, ln1_b, i_w, i_b, f_w, f_b, ln2_g, ln2_b = [], [], [], [], [], [], [], []
    for _ in range(NUM_LAYERS):
        qw, kw, vw = w((HIDDEN, HIDDEN)), w((HIDDEN, HIDDEN)), w((HIDDEN, HIDDEN))
        qkv_w.append(jnp.concatenate([qw, kw, vw], axis=1))
        qkv_b.append(jnp.zeros((1, 3 * HIDDEN), jnp.float32))
        o_w.append(w((HIDDEN, HIDDEN))); o_b.append(jnp.zeros((1, HIDDEN), jnp.float32))
        ln1_g.append(jnp.ones((1, HIDDEN), jnp.float32)); ln1_b.append(jnp.zeros((1, HIDDEN), jnp.float32))
        i_w.append(w((HIDDEN, INTERMEDIATE))); i_b.append(jnp.zeros((1, INTERMEDIATE), jnp.float32))
        f_w.append(w((INTERMEDIATE, HIDDEN))); f_b.append(jnp.zeros((1, HIDDEN), jnp.float32))
        ln2_g.append(jnp.ones((1, HIDDEN), jnp.float32)); ln2_b.append(jnp.zeros((1, HIDDEN), jnp.float32))
    params.update({
        "qkv_w": jnp.stack(qkv_w), "qkv_b": jnp.stack(qkv_b),
        "o_w": jnp.stack(o_w), "o_b": jnp.stack(o_b),
        "ln1_g": jnp.stack(ln1_g), "ln1_b": jnp.stack(ln1_b),
        "i_w": jnp.stack(i_w), "i_b": jnp.stack(i_b),
        "f_w": jnp.stack(f_w), "f_b": jnp.stack(f_b),
        "ln2_g": jnp.stack(ln2_g), "ln2_b": jnp.stack(ln2_b),
    })

    # GAT heads fused along output lanes: fc [H, 4H], attn split into per-head wa1/wa2
    fc_ws, wa1s, wa2s = [], [], []
    for _ in range(GAT_HEADS):
        fc = w((HIDDEN, HIDDEN))            # stored [in, out]
        aw = w((2 * HIDDEN, 1))             # stored [in, out]
        fc_ws.append(fc)
        wa1s.append(aw[:HIDDEN, 0])
        wa2s.append(aw[HIDDEN:, 0])
    params["gat_fc_w"] = jnp.concatenate(fc_ws, axis=1)          # [H, 4H]
    params["gat_wa1"] = jnp.concatenate(wa1s)[None, :]           # [1, 4H]
    params["gat_wa2"] = jnp.concatenate(wa2s)[None, :]           # [1, 4H]
    return params


# ---------------------------------------------------------------------------
# GraphEncoder.forward (graph glue in JAX, edge math in the GAT kernel)
# ---------------------------------------------------------------------------
def graph_encoder(params, graph):
    node_idx = graph["node_idx"]
    edge_idx = graph["edge_idx"]
    src = graph["edge_src"]
    dst = graph["edge_dst"]
    gid = graph["node_graph_id"]
    N = node_idx.shape[0]
    E = src.shape[0]

    rel_h = jnp.take(params["rel_emb"], node_idx, axis=0)        # [N, H]
    pat_h = jnp.take(params["pat_emb"], edge_idx, axis=0)        # [E, H]
    src_h = jnp.take(rel_h, src, axis=0)                         # [E, H]
    dst_h = jnp.take(rel_h, dst, axis=0)                         # [E, H]

    z1_all, e_all = gat_edges(src_h, dst_h, pat_h,
                              params["gat_fc_w"], params["gat_wa1"], params["gat_wa2"])

    # reduce_func: per-node softmax over incoming edges, weighted sum of m=z1 (all heads at once)
    e_max = jax.ops.segment_max(e_all, dst, num_segments=N)      # [N, GAT_HEADS]
    e_max = jnp.where(jnp.isfinite(e_max), e_max, 0.0)
    e_exp = jnp.exp(e_all - e_max[dst])                          # [E, GAT_HEADS]
    denom = jax.ops.segment_sum(e_exp, dst, num_segments=N)      # [N, GAT_HEADS]
    alpha = e_exp / jnp.maximum(denom[dst], 1e-20)               # [E, GAT_HEADS]
    z1_heads = z1_all.reshape(E, GAT_HEADS, HIDDEN)
    head_sum = jax.ops.segment_sum(alpha[:, :, None] * z1_heads, dst, num_segments=N)  # [N, GH, H]
    # TODO(synk): DGL's update_all leaves zero-in-degree nodes' 'h' untouched; test graph has none.

    # MultiHeadGATLayer: torch.mean(torch.stack(head_outs)) -> scalar (matches the PyTorch spec)
    h1 = jnp.mean(head_sum)
    h1 = jnp.maximum(h1, 0.0)                                    # GraphEncoder.act = ReLU
    f = rel_h + h1                                               # g.ndata['f'] = rel_h + h_1
    e_h = jax.ops.segment_sum(f, gid, num_segments=BATCH)        # dgl.sum_nodes -> [num_graphs, H]
    return e_h


def bce_with_logits_mean(logits, labels):
    # 18-element tail; plain jnp is cheaper than another pallas_call at this size.
    x = logits.astype(jnp.float32)
    y = labels.astype(jnp.float32)
    loss = jnp.maximum(x, 0.0) - x * y + jnp.log1p(jnp.exp(-jnp.abs(x)))
    return jnp.mean(loss)


# ---------------------------------------------------------------------------
# Full forward
# ---------------------------------------------------------------------------
@jax.jit
def open_entity_forward(params, input_ids, token_type_ids, attention_mask, labels, graph):
    # input_embed = token_embedding(input_ids)
    input_embed = jnp.take(params["tok_emb"], input_ids, axis=0)           # [B, S, H]
    # head_embed = ent_embedding(h_id)  (GraphEncoder over the batched graph)
    head_embed = graph_encoder(params, graph)                              # [B, H]
    # input_embed[:, 1] = head_embed
    input_embed = input_embed.at[:, 1].set(head_embed)

    pos = params["pos_emb"][:SEQ][None, :, :]
    typ = jnp.take(params["type_emb"], token_type_ids, axis=0)
    x_emb = (input_embed + pos + typ).astype(jnp.float32)                  # [B, S, H]
    # TODO(synk): dropout omitted (deterministic / eval-mode semantics).

    add_mask = ((1.0 - attention_mask.astype(jnp.float32)) * -1e9)[:, None, :]   # [B, 1, S]

    logits = bert_encoder(params, x_emb, add_mask)                         # [B, 9]
    loss = bce_with_logits_mean(logits, labels)                            # multi-label BCE
    return loss, logits


if __name__ == "__main__":
    key = jax.random.PRNGKey(0)
    pk, ik, lk, gk = jax.random.split(key, 4)
    params = init_params(pk)

    input_ids = jax.random.randint(ik, (BATCH, SEQ), 0, VOCAB, dtype=jnp.int32)
    token_type_ids = jnp.zeros((BATCH, SEQ), jnp.int32)
    attention_mask = jnp.ones((BATCH, SEQ), jnp.int32).at[1, -2:].set(0)
    labels = (jax.random.uniform(lk, (BATCH, NUM_LABELS)) > 0.5).astype(jnp.float32)

    # batched graph: 2 graphs x 3 nodes, every node has >=1 incoming edge
    graph = {
        "node_idx": jnp.array([1, 2, 3, 4, 5, 6], jnp.int32),
        "node_graph_id": jnp.array([0, 0, 0, 1, 1, 1], jnp.int32),
        "edge_src": jnp.array([0, 1, 2, 1, 3, 4, 5, 4], jnp.int32),
        "edge_dst": jnp.array([1, 2, 0, 0, 4, 5, 3, 3], jnp.int32),
        "edge_idx": jax.random.randint(gk, (8,), 0, PAT_VOCAB, dtype=jnp.int32),
    }

    loss, logits = open_entity_forward(params, input_ids, token_type_ids,
                                       attention_mask, labels, graph)
    jax.block_until_ready((loss, logits))
    assert logits.shape == (BATCH, NUM_LABELS)
    print("KERNEL_OK")
</pallas_src>

<mosaic_0001>
module attributes {stable_mosaic.version = 11 : i64} {
  func.func @_gat_kernel(%arg0: i32, %arg1: memref<8x32xf32, #tpu.memory_space<vmem>>, %arg2: memref<8x32xf32, #tpu.memory_space<vmem>>, %arg3: memref<8x32xf32, #tpu.memory_space<vmem>>, %arg4: memref<32x128xf32, #tpu.memory_space<vmem>>, %arg5: memref<1x128xf32, #tpu.memory_space<vmem>>, %arg6: memref<1x128xf32, #tpu.memory_space<vmem>>, %arg7: memref<8x128xf32, #tpu.memory_space<vmem>>, %arg8: memref<8x4xf32, #tpu.memory_space<vmem>>) attributes {dimension_semantics = [#tpu.dimension_semantics<arbitrary>], iteration_bounds = array<i64: 1>, scalar_prefetch = 0 : i64, scratch_operands = 0 : i64, tpu.core_type = #tpu.core_type<tc>, window_params = [{pipeline_mode = #tpu.pipeline_mode<synchronous>, transform_indices = @transform_0, window_bounds = array<i64: 8, 32>}, {pipeline_mode = #tpu.pipeline_mode<synchronous>, transform_indices = @transform_1, window_bounds = array<i64: 8, 32>}, {pipeline_mode = #tpu.pipeline_mode<synchronous>, transform_indices = @transform_2, window_bounds = array<i64: 8, 32>}, {pipeline_mode = #tpu.pipeline_mode<synchronous>, transform_indices = @transform_3, window_bounds = array<i64: 32, 128>}, {pipeline_mode = #tpu.pipeline_mode<synchronous>, transform_indices = @transform_4, window_bounds = array<i64: 1, 128>}, {pipeline_mode = #tpu.pipeline_mode<synchronous>, transform_indices = @transform_5, window_bounds = array<i64: 1, 128>}, {pipeline_mode = #tpu.pipeline_mode<synchronous>, transform_indices = @transform_6, window_bounds = array<i64: 8, 128>}, {pipeline_mode = #tpu.pipeline_mode<synchronous>, transform_indices = @transform_7, window_bounds = array<i64: 8, 4>}]} {
    %c0 = arith.constant 0 : index
    %c0_0 = arith.constant 0 : index
    %0 = vector.load %arg1[%c0, %c0_0] : memref<8x32xf32, #tpu.memory_space<vmem>>, vector<8x32xf32>
    %c0_1 = arith.constant 0 : index
    %c0_2 = arith.constant 0 : index
    %1 = vector.load %arg3[%c0_1, %c0_2] : memref<8x32xf32, #tpu.memory_space<vmem>>, vector<8x32xf32>
    %2 = arith.mulf %0, %1 : vector<8x32xf32>
    %c0_3 = arith.constant 0 : index
    %c0_4 = arith.constant 0 : index
    %3 = vector.load %arg4[%c0_3, %c0_4] : memref<32x128xf32, #tpu.memory_space<vmem>>, vector<32x128xf32>
    %cst = arith.constant dense<0.000000e+00> : vector<8x128xf32>
    %4 = tpu.matmul %2, %3, %cst {dimension_numbers = #tpu.dot_dimension_numbers<[1], [0], [0], [1], [0, 0, 1, 1], [], []>} : vector<8x32xf32>, vector<32x128xf32>, vector<8x128xf32> -> vector<8x128xf32>
    %c0_5 = arith.constant 0 : index
    %c0_6 = arith.constant 0 : index
    %5 = vector.load %arg2[%c0_5, %c0_6] : memref<8x32xf32, #tpu.memory_space<vmem>>, vector<8x32xf32>
    %c0_7 = arith.constant 0 : index
    %c0_8 = arith.constant 0 : index
    %6 = vector.load %arg4[%c0_7, %c0_8] : memref<32x128xf32, #tpu.memory_space<vmem>>, vector<32x128xf32>
    %cst_9 = arith.constant dense<0.000000e+00> : vector<8x128xf32>
    %7 = tpu.matmul %5, %6, %cst_9 {dimension_numbers = #tpu.dot_dimension_numbers<[1], [0], [0], [1], [0, 0, 1, 1], [], []>} : vector<8x32xf32>, vector<32x128xf32>, vector<8x128xf32> -> vector<8x128xf32>
    %c0_10 = arith.constant 0 : index
    %c0_11 = arith.constant 0 : index
    %8 = vector.load %arg5[%c0_10, %c0_11] : memref<1x128xf32, #tpu.memory_space<vmem>>, vector<1x128xf32>
    %9 = vector.broadcast %8 : vector<1x128xf32> to vector<8x128xf32>
    %10 = arith.mulf %4, %9 : vector<8x128xf32>
    %c0_12 = arith.constant 0 : index
    %c0_13 = arith.constant 0 : index
    %11 = vector.load %arg6[%c0_12, %c0_13] : memref<1x128xf32, #tpu.memory_space<vmem>>, vector<1x128xf32>
    %12 = vector.broadcast %11 : vector<1x128xf32> to vector<8x128xf32>
    %13 = arith.mulf %7, %12 : vector<8x128xf32>
    %14 = arith.addf %10, %13 : vector<8x128xf32>
    %15 = vector.extract_strided_slice %14 {offsets = [0, 0], sizes = [8, 32], strides = [1, 1]} : vector<8x128xf32> to vector<8x32xf32>
    %cst_14 = arith.constant dense<0.000000e+00> : vector<8xf32>
    %16 = vector.multi_reduction <add>, %15, %cst_14 [1] : vector<8x32xf32> to vector<8xf32>
    %17 = vector.shape_cast %16 : vector<8xf32> to vector<8x1xf32>
    %18 = vector.extract_strided_slice %14 {offsets = [0, 32], sizes = [8, 32], strides = [1, 1]} : vector<8x128xf32> to vector<8x32xf32>
    %cst_15 = arith.constant dense<0.000000e+00> : vector<8xf32>
    %19 = vector.multi_reduction <add>, %18, %cst_15 [1] : vector<8x32xf32> to vector<8xf32>
    %20 = vector.shape_cast %19 : vector<8xf32> to vector<8x1xf32>
    %21 = vector.extract_strided_slice %14 {offsets = [0, 64], sizes = [8, 32], strides = [1, 1]} : vector<8x128xf32> to vector<8x32xf32>
    %cst_16 = arith.constant dense<0.000000e+00> : vector<8xf32>
    %22 = vector.multi_reduction <add>, %21, %cst_16 [1] : vector<8x32xf32> to vector<8xf32>
    %23 = vector.shape_cast %22 : vector<8xf32> to vector<8x1xf32>
    %24 = vector.extract_strided_slice %14 {offsets = [0, 96], sizes = [8, 32], strides = [1, 1]} : vector<8x128xf32> to vector<8x32xf32>
    %cst_17 = arith.constant dense<0.000000e+00> : vector<8xf32>
    %25 = vector.multi_reduction <add>, %24, %cst_17 [1] : vector<8x32xf32> to vector<8xf32>
    %26 = vector.shape_cast %25 : vector<8xf32> to vector<8x1xf32>
    %27 = tpu.concatenate %17, %20, %23, %26 in 1 : vector<8x1xf32>, vector<8x1xf32>, vector<8x1xf32>, vector<8x1xf32> -> vector<8x4xf32>
    %c0_18 = arith.constant 0 : index
    %c0_19 = arith.constant 0 : index
    %28 = vector.load %arg7[%c0_18, %c0_19] : memref<8x128xf32, #tpu.memory_space<vmem>>, vector<8x128xf32>
    tpu.vector_store %arg7[%c0_18, %c0_19], %4 {strides = array<i32>} : memref<8x128xf32, #tpu.memory_space<vmem>>, vector<8x128xf32>,
    %cst_20 = arith.constant 0.000000e+00 : f32
    %29 = vector.broadcast %cst_20 : f32 to vector<8x4xf32>
    %30 = arith.cmpf ogt, %27, %29 : vector<8x4xf32>
    %cst_21 = arith.constant 0.00999999977 : f32
    %31 = vector.broadcast %cst_21 : f32 to vector<8x4xf32>
    %32 = arith.mulf %31, %27 : vector<8x4xf32>
    %33 = arith.select %30, %27, %32 : vector<8x4xi1>, vector<8x4xf32>
    %c0_22 = arith.constant 0 : index
    %c0_23 = arith.constant 0 : index
    %34 = vector.load %arg8[%c0_22, %c0_23] : memref<8x4xf32, #tpu.memory_space<vmem>>, vector<8x4xf32>
    tpu.vector_store %arg8[%c0_22, %c0_23], %33 {strides = array<i32>} : memref<8x4xf32, #tpu.memory_space<vmem>>, vector<8x4xf32>,
    return
  }
  func.func @transform_0(%arg0: i32) -> (i32, i32) {
    %c0_i32 = arith.constant 0 : i32
    %c0_i32_0 = arith.constant 0 : i32
    %c0_i32_1 = arith.constant 0 : i32
    return %c0_i32, %c0_i32_0 : i32, i32
  }
  func.func @transform_1(%arg0: i32) -> (i32, i32) {
    %c0_i32 = arith.constant 0 : i32
    %c0_i32_0 = arith.constant 0 : i32
    %c0_i32_1 = arith.constant 0 : i32
    return %c0_i32, %c0_i32_0 : i32, i32
  }
  func.func @transform_2(%arg0: i32) -> (i32, i32) {
    %c0_i32 = arith.constant 0 : i32
    %c0_i32_0 = arith.constant 0 : i32
    %c0_i32_1 = arith.constant 0 : i32
    return %c0_i32, %c0_i32_0 : i32, i32
  }
  func.func @transform_3(%arg0: i32) -> (i32, i32) {
    %c0_i32 = arith.constant 0 : i32
    %c0_i32_0 = arith.constant 0 : i32
    %c0_i32_1 = arith.constant 0 : i32
    return %c0_i32, %c0_i32_0 : i32, i32
  }
  func.func @transform_4(%arg0: i32) -> (i32, i32) {
    %c0_i32 = arith.constant 0 : i32
    %c0_i32_0 = arith.constant 0 : i32
    %c0_i32_1 = arith.constant 0 : i32
    return %c0_i32, %c0_i32_0 : i32, i32
  }
  func.func @transform_5(%arg0: i32) -> (i32, i32) {
    %c0_i32 = arith.constant 0 : i32
    %c0_i32_0 = arith.constant 0 : i32
    %c0_i32_1 = arith.constant 0 : i32
    return %c0_i32, %c0_i32_0 : i32, i32
  }
  func.func @transform_6(%arg0: i32) -> (i32, i32) {
    %c0_i32 = arith.constant 0 : i32
    %c0_i32_0 = arith.constant 0 : i32
    %c0_i32_1 = arith.constant 0 : i32
    return %c0_i32, %c0_i32_0 : i32, i32
  }
  func.func @transform_7(%arg0: i32) -> (i32, i32) {
    %c0_i32 = arith.constant 0 : i32
    %c0_i32_0 = arith.constant 0 : i32
    %c0_i32_1 = arith.constant 0 : i32
    return %c0_i32, %c0_i32_0 : i32, i32
  }
}

module attributes {stable_mosaic.version = 11 : i64} {
  func.func @_bert_encoder_kernel(%arg0: i32, %arg1: memref<1x8x32xf32, #tpu.memory_space<vmem>>, %arg2: memref<1x1x8xf32, #tpu.memory_space<vmem>>, %arg3: memref<1x32xf32, #tpu.memory_space<vmem>>, %arg4: memref<1x32xf32, #tpu.memory_space<vmem>>, %arg5: memref<2x32x96xf32, #tpu.memory_space<vmem>>, %arg6: memref<2x1x96xf32, #tpu.memory_space<vmem>>, %arg7: memref<2x32x32xf32, #tpu.memory_space<vmem>>, %arg8: memref<2x1x32xf32, #tpu.memory_space<vmem>>, %arg9: memref<2x1x32xf32, #tpu.memory_space<vmem>>, %arg10: memref<2x1x32xf32, #tpu.memory_space<vmem>>, %arg11: memref<2x32x64xf32, #tpu.memory_space<vmem>>, %arg12: memref<2x1x64xf32, #tpu.memory_space<vmem>>, %arg13: memref<2x64x32xf32, #tpu.memory_space<vmem>>, %arg14: memref<2x1x32xf32, #tpu.memory_space<vmem>>, %arg15: memref<2x1x32xf32, #tpu.memory_space<vmem>>, %arg16: memref<2x1x32xf32, #tpu.memory_space<vmem>>, %arg17: memref<32x32xf32, #tpu.memory_space<vmem>>, %arg18: memref<1x32xf32, #tpu.memory_space<vmem>>, %arg19: memref<32x9xf32, #tpu.memory_space<vmem>>, %arg20: memref<1x9xf32, #tpu.memory_space<vmem>>, %arg21: memref<1x1x9xf32, #tpu.memory_space<vmem>>) attributes {dimension_semantics = [#tpu.dimension_semantics<parallel>], iteration_bounds = array<i64: 2>, scalar_prefetch = 0 : i64, scratch_operands = 0 : i64, tpu.core_type = #tpu.core_type<tc>, window_params = [{transform_indices = @transform_0, window_bounds = array<i64: 1, 8, 32>}, {transform_indices = @transform_1, window_bounds = array<i64: 1, 1, 8>}, {pipeline_mode = #tpu.pipeline_mode<synchronous>, transform_indices = @transform_2, window_bounds = array<i64: 1, 32>}, {pipeline_mode = #tpu.pipeline_mode<synchronous>, transform_indices = @transform_3, window_bounds = array<i64: 1, 32>}, {pipeline_mode = #tpu.pipeline_mode<synchronous>, transform_indices = @transform_4, window_bounds = array<i64: 2, 32, 96>}, {pipeline_mode = #tpu.pipeline_mode<synchronous>, transform_indices = @transform_5, window_bounds = array<i64: 2, 1, 96>}, {pipeline_mode = #tpu.pipeline_mode<synchronous>, transform_indices = @transform_6, window_bounds = array<i64: 2, 32, 32>}, {pipeline_mode = #tpu.pipeline_mode<synchronous>, transform_indices = @transform_7, window_bounds = array<i64: 2, 1, 32>}, {pipeline_mode = #tpu.pipeline_mode<synchronous>, transform_indices = @transform_8, window_bounds = array<i64: 2, 1, 32>}, {pipeline_mode = #tpu.pipeline_mode<synchronous>, transform_indices = @transform_9, window_bounds = array<i64: 2, 1, 32>}, {pipeline_mode = #tpu.pipeline_mode<synchronous>, transform_indices = @transform_10, window_bounds = array<i64: 2, 32, 64>}, {pipeline_mode = #tpu.pipeline_mode<synchronous>, transform_indices = @transform_11, window_bounds = array<i64: 2, 1, 64>}, {pipeline_mode = #tpu.pipeline_mode<synchronous>, transform_indices = @transform_12, window_bounds = array<i64: 2, 64, 32>}, {pipeline_mode = #tpu.pipeline_mode<synchronous>, transform_indices = @transform_13, window_bounds = array<i64: 2, 1, 32>}, {pipeline_mode = #tpu.pipeline_mode<synchronous>, transform_indices = @transform_14, window_bounds = array<i64: 2, 1, 32>}, {pipeline_mode = #tpu.pipeline_mode<synchronous>, transform_indices = @transform_15, window_bounds = array<i64: 2, 1, 32>}, {pipeline_mode = #tpu.pipeline_mode<synchronous>, transform_indices = @transform_16, window_bounds = array<i64: 32, 32>}, {pipeline_mode = #tpu.pipeline_mode<synchronous>, transform_indices = @transform_17, window_bounds = array<i64: 1, 32>}, {pipeline_mode = #tpu.pipeline_mode<synchronous>, transform_indices = @transform_18, window_bounds = array<i64: 32, 9>}, {pipeline_mode = #tpu.pipeline_mode<synchronous>, transform_indices = @transform_19, window_bounds = array<i64: 1, 9>}, {transform_indices = @transform_20, window_bounds = array<i64: 1, 1, 9>}]} {
    %c0 = arith.constant 0 : index
    %c0_0 = arith.constant 0 : index
    %c0_1 = arith.constant 0 : index
    %0 = vector.load %arg1[%c0, %c0_0, %c0_1] : memref<1x8x32xf32, #tpu.memory_space<vmem>>, vector<1x8x32xf32>
    %1 = vector.shape_cast %0 : vector<1x8x32xf32> to vector<8x32xf32>
    %c0_2 = arith.constant 0 : index
    %c0_3 = arith.constant 0 : index
    %2 = vector.load %arg3[%c0_2, %c0_3] : memref<1x32xf32, #tpu.memory_space<vmem>>, vector<1x32xf32>
    %c0_4 = arith.constant 0 : index
    %c0_5 = arith.constant 0 : index
    %3 = vector.load %arg4[%c0_4, %c0_5] : memref<1x32xf32, #tpu.memory_space<vmem>>, vector<1x32xf32>
    %cst = arith.constant dense<0.000000e+00> : vector<8xf32>
    %4 = vector.multi_reduction <add>, %1, %cst [1] : vector<8x32xf32> to vector<8xf32>
    %5 = vector.shape_cast %4 : vector<8xf32> to vector<8x1xf32>
    %cst_6 = arith.constant 3.200000e+01 : f32
    %6 = vector.broadcast %cst_6 : f32 to vector<8x1xf32>
    %7 = arith.divf %5, %6 : vector<8x1xf32>
    %8 = vector.broadcast %7 : vector<8x1xf32> to vector<8x32xf32>
    %9 = arith.subf %1, %8 : vector<8x32xf32>
    %10 = arith.mulf %9, %9 : vector<8x32xf32>
    %cst_7 = arith.constant dense<0.000000e+00> : vector<8xf32>
    %11 = vector.multi_reduction <add>, %10, %cst_7 [1] : vector<8x32xf32> to vector<8xf32>
    %12 = vector.shape_cast %11 : vector<8xf32> to vector<8x1xf32>
    %cst_8 = arith.constant 3.200000e+01 : f32
    %13 = vector.broadcast %cst_8 : f32 to vector<8x1xf32>
    %14 = arith.divf %12, %13 : vector<8x1xf32>
    %15 = vector.broadcast %7 : vector<8x1xf32> to vector<8x32xf32>
    %16 = arith.subf %1, %15 : vector<8x32xf32>
    %cst_9 = arith.constant 9.99999996E-13 : f32
    %17 = vector.broadcast %cst_9 : f32 to vector<8x1xf32>
    %18 = arith.addf %14, %17 : vector<8x1xf32>
    %19 = math.rsqrt %18 : vector<8x1xf32>
    %20 = vector.broadcast %19 : vector<8x1xf32> to vector<8x32xf32>
    %21 = arith.mulf %16, %20 : vector<8x32xf32>
    %22 = vector.broadcast %2 : vector<1x32xf32> to vector<8x32xf32>
    %23 = arith.mulf %21, %22 : vector<8x32xf32>
    %24 = vector.broadcast %3 : vector<1x32xf32> to vector<8x32xf32>
    %25 = arith.addf %23, %24 : vector<8x32xf32>
    %c0_10 = arith.constant 0 : index
    %c0_11 = arith.constant 0 : index
    %c0_12 = arith.constant 0 : index
    %26 = vector.load %arg2[%c0_10, %c0_11, %c0_12] : memref<1x1x8xf32, #tpu.memory_space<vmem>>, vector<1x1x8xf32>
    %27 = vector.shape_cast %26 : vector<1x1x8xf32> to vector<1x8xf32>
    %c0_13 = arith.constant 0 : index
    %c0_14 = arith.constant 0 : index
    %c0_15 = arith.constant 0 : index
    %28 = vector.load %arg5[%c0_13, %c0_14, %c0_15] : memref<2x32x96xf32, #tpu.memory_space<vmem>>, vector<1x32x96xf32>
    %29 = vector.shape_cast %28 : vector<1x32x96xf32> to vector<32x96xf32>
    %cst_16 = arith.constant dense<0.000000e+00> : vector<8x96xf32>
    %30 = tpu.matmul %25, %29, %cst_16 {dimension_numbers = #tpu.dot_dimension_numbers<[1], [0], [0], [1], [0, 0, 1, 1], [], []>} : vector<8x32xf32>, vector<32x96xf32>, vector<8x96xf32> -> vector<8x96xf32>
    %c0_17 = arith.constant 0 : index
    %c0_18 = arith.constant 0 : index
    %c0_19 = arith.constant 0 : index
    %31 = vector.load %arg6[%c0_17, %c0_18, %c0_19] : memref<2x1x96xf32, #tpu.memory_space<vmem>>, vector<1x1x96xf32>
    %32 = vector.shape_cast %31 : vector<1x1x96xf32> to vector<1x96xf32>
    %33 = vector.broadcast %32 : vector<1x96xf32> to vector<8x96xf32>
    %34 = arith.addf %30, %33 : vector<8x96xf32>
    %35 = vector.extract_strided_slice %34 {offsets = [0, 0], sizes = [8, 16], strides = [1, 1]} : vector<8x96xf32> to vector<8x16xf32>
    %36 = vector.extract_strided_slice %34 {offsets = [0, 32], sizes = [8, 16], strides = [1, 1]} : vector<8x96xf32> to vector<8x16xf32>
    %37 = vector.extract_strided_slice %34 {offsets = [0, 64], sizes = [8, 16], strides = [1, 1]} : vector<8x96xf32> to vector<8x16xf32>
    %38 = tpu.transpose %36, [1, 0] : vector<8x16xf32> -> vector<16x8xf32>
    %cst_20 = arith.constant dense<0.000000e+00> : vector<8x8xf32>
    %39 = tpu.matmul %35, %38, %cst_20 {dimension_numbers = #tpu.dot_dimension_numbers<[1], [0], [0], [1], [0, 0, 1, 1], [], []>} : vector<8x16xf32>, vector<16x8xf32>, vector<8x8xf32> -> vector<8x8xf32>
    %cst_21 = arith.constant 2.500000e-01 : f32
    %40 = vector.broadcast %cst_21 : f32 to vector<8x8xf32>
    %41 = arith.mulf %39, %40 : vector<8x8xf32>
    %42 = vector.broadcast %27 : vector<1x8xf32> to vector<8x8xf32>
    %43 = arith.addf %41, %42 : vector<8x8xf32>
    %cst_22 = arith.constant dense<0xFF800000> : vector<8xf32>
    %44 = vector.multi_reduction <maximumf>, %43, %cst_22 [1] : vector<8x8xf32> to vector<8xf32>
    %45 = vector.shape_cast %44 : vector<8xf32> to vector<8x1xf32>
    %46 = vector.broadcast %45 : vector<8x1xf32> to vector<8x8xf32>
    %47 = arith.subf %43, %46 : vector<8x8xf32>
    %48 = math.exp %47 : vector<8x8xf32>
    %cst_23 = arith.constant dense<0.000000e+00> : vector<8xf32>
    %49 = vector.multi_reduction <add>, %48, %cst_23 [1] : vector<8x8xf32> to vector<8xf32>
    %50 = vector.shape_cast %49 : vector<8xf32> to vector<8x1xf32>
    %51 = tpu.reciprocal %50 : vector<8x1xf32> -> vector<8x1xf32>
    %52 = vector.broadcast %51 : vector<8x1xf32> to vector<8x8xf32>
    %53 = arith.mulf %48, %52 : vector<8x8xf32>
    %cst_24 = arith.constant dense<0.000000e+00> : vector<8x16xf32>
    %54 = tpu.matmul %53, %37, %cst_24 {dimension_numbers = #tpu.dot_dimension_numbers<[1], [0], [0], [1], [0, 0, 1, 1], [], []>} : vector<8x8xf32>, vector<8x16xf32>, vector<8x16xf32> -> vector<8x16xf32>
    %55 = vector.extract_strided_slice %34 {offsets = [0, 16], sizes = [8, 16], strides = [1, 1]} : vector<8x96xf32> to vector<8x16xf32>
    %56 = vector.extract_strided_slice %34 {offsets = [0, 48], sizes = [8, 16], strides = [1, 1]} : vector<8x96xf32> to vector<8x16xf32>
    %57 = vector.extract_strided_slice %34 {offsets = [0, 80], sizes = [8, 16], strides = [1, 1]} : vector<8x96xf32> to vector<8x16xf32>
    %58 = tpu.transpose %56, [1, 0] : vector<8x16xf32> -> vector<16x8xf32>
    %cst_25 = arith.constant dense<0.000000e+00> : vector<8x8xf32>
    %59 = tpu.matmul %55, %58, %cst_25 {dimension_numbers = #tpu.dot_dimension_numbers<[1], [0], [0], [1], [0, 0, 1, 1], [], []>} : vector<8x16xf32>, vector<16x8xf32>, vector<8x8xf32> -> vector<8x8xf32>
    %cst_26 = arith.constant 2.500000e-01 : f32
    %60 = vector.broadcast %cst_26 : f32 to vector<8x8xf32>
    %61 = arith.mulf %59, %60 : vector<8x8xf32>
    %62 = vector.broadcast %27 : vector<1x8xf32> to vector<8x8xf32>
    %63 = arith.addf %61, %62 : vector<8x8xf32>
    %cst_27 = arith.constant dense<0xFF800000> : vector<8xf32>
    %64 = vector.multi_reduction <maximumf>, %63, %cst_27 [1] : vector<8x8xf32> to vector<8xf32>
    %65 = vector.shape_cast %64 : vector<8xf32> to vector<8x1xf32>
    %66 = vector.broadcast %65 : vector<8x1xf32> to vector<8x8xf32>
    %67 = arith.subf %63, %66 : vector<8x8xf32>
    %68 = math.exp %67 : vector<8x8xf32>
    %cst_28 = arith.constant dense<0.000000e+00> : vector<8xf32>
    %69 = vector.multi_reduction <add>, %68, %cst_28 [1] : vector<8x8xf32> to vector<8xf32>
    %70 = vector.shape_cast %69 : vector<8xf32> to vector<8x1xf32>
    %71 = tpu.reciprocal %70 : vector<8x1xf32> -> vector<8x1xf32>
    %72 = vector.broadcast %71 : vector<8x1xf32> to vector<8x8xf32>
    %73 = arith.mulf %68, %72 : vector<8x8xf32>
    %cst_29 = arith.constant dense<0.000000e+00> : vector<8x16xf32>
    %74 = tpu.matmul %73, %57, %cst_29 {dimension_numbers = #tpu.dot_dimension_numbers<[1], [0], [0], [1], [0, 0, 1, 1], [], []>} : vector<8x8xf32>, vector<8x16xf32>, vector<8x16xf32> -> vector<8x16xf32>
    %75 = tpu.concatenate %54, %74 in 1 : vector<8x16xf32>, vector<8x16xf32> -> vector<8x32xf32>
    %c0_30 = arith.constant 0 : index
    %c0_31 = arith.constant 0 : index
    %c0_32 = arith.constant 0 : index
    %76 = vector.load %arg7[%c0_30, %c0_31, %c0_32] : memref<2x32x32xf32, #tpu.memory_space<vmem>>, vector<1x32x32xf32>
    %77 = vector.shape_cast %76 : vector<1x32x32xf32> to vector<32x32xf32>
    %cst_33 = arith.constant dense<0.000000e+00> : vector<8x32xf32>
    %78 = tpu.matmul %75, %77, %cst_33 {dimension_numbers = #tpu.dot_dimension_numbers<[1], [0], [0], [1], [0, 0, 1, 1], [], []>} : vector<8x32xf32>, vector<32x32xf32>, vector<8x32xf32> -> vector<8x32xf32>
    %c0_34 = arith.constant 0 : index
    %c0_35 = arith.constant 0 : index
    %c0_36 = arith.constant 0 : index
    %79 = vector.load %arg8[%c0_34, %c0_35, %c0_36] : memref<2x1x32xf32, #tpu.memory_space<vmem>>, vector<1x1x32xf32>
    %80 = vector.shape_cast %79 : vector<1x1x32xf32> to vector<1x32xf32>
    %81 = vector.broadcast %80 : vector<1x32xf32> to vector<8x32xf32>
    %82 = arith.addf %78, %81 : vector<8x32xf32>
    %83 = arith.addf %82, %25 : vector<8x32xf32>
    %c0_37 = arith.constant 0 : index
    %c0_38 = arith.constant 0 : index
    %c0_39 = arith.constant 0 : index
    %84 = vector.load %arg9[%c0_37, %c0_38, %c0_39] : memref<2x1x32xf32, #tpu.memory_space<vmem>>, vector<1x1x32xf32>
    %85 = vector.shape_cast %84 : vector<1x1x32xf32> to vector<1x32xf32>
    %c0_40 = arith.constant 0 : index
    %c0_41 = arith.constant 0 : index
    %c0_42 = arith.constant 0 : index
    %86 = vector.load %arg10[%c0_40, %c0_41, %c0_42] : memref<2x1x32xf32, #tpu.memory_space<vmem>>, vector<1x1x32xf32>
    %87 = vector.shape_cast %86 : vector<1x1x32xf32> to vector<1x32xf32>
    %cst_43 = arith.constant dense<0.000000e+00> : vector<8xf32>
    %88 = vector.multi_reduction <add>, %83, %cst_43 [1] : vector<8x32xf32> to vector<8xf32>
    %89 = vector.shape_cast %88 : vector<8xf32> to vector<8x1xf32>
    %cst_44 = arith.constant 3.200000e+01 : f32
    %90 = vector.broadcast %cst_44 : f32 to vector<8x1xf32>
    %91 = arith.divf %89, %90 : vector<8x1xf32>
    %92 = vector.broadcast %91 : vector<8x1xf32> to vector<8x32xf32>
    %93 = arith.subf %83, %92 : vector<8x32xf32>
    %94 = arith.mulf %93, %93 : vector<8x32xf32>
    %cst_45 = arith.constant dense<0.000000e+00> : vector<8xf32>
    %95 = vector.multi_reduction <add>, %94, %cst_45 [1] : vector<8x32xf32> to vector<8xf32>
    %96 = vector.shape_cast %95 : vector<8xf32> to vector<8x1xf32>
    %cst_46 = arith.constant 3.200000e+01 : f32
    %97 = vector.broadcast %cst_46 : f32 to vector<8x1xf32>
    %98 = arith.divf %96, %97 : vector<8x1xf32>
    %99 = vector.broadcast %91 : vector<8x1xf32> to vector<8x32xf32>
    %100 = arith.subf %83, %99 : vector<8x32xf32>
    %cst_47 = arith.constant 9.99999996E-13 : f32
    %101 = vector.broadcast %cst_47 : f32 to vector<8x1xf32>
    %102 = arith.addf %98, %101 : vector<8x1xf32>
    %103 = math.rsqrt %102 : vector<8x1xf32>
    %104 = vector.broadcast %103 : vector<8x1xf32> to vector<8x32xf32>
    %105 = arith.mulf %100, %104 : vector<8x32xf32>
    %106 = vector.broadcast %85 : vector<1x32xf32> to vector<8x32xf32>
    %107 = arith.mulf %105, %106 : vector<8x32xf32>
    %108 = vector.broadcast %87 : vector<1x32xf32> to vector<8x32xf32>
    %109 = arith.addf %107, %108 : vector<8x32xf32>
    %c0_48 = arith.constant 0 : index
    %c0_49 = arith.constant 0 : index
    %c0_50 = arith.constant 0 : index
    %110 = vector.load %arg11[%c0_48, %c0_49, %c0_50] : memref<2x32x64xf32, #tpu.memory_space<vmem>>, vector<1x32x64xf32>
    %111 = vector.shape_cast %110 : vector<1x32x64xf32> to vector<32x64xf32>
    %cst_51 = arith.constant dense<0.000000e+00> : vector<8x64xf32>
    %112 = tpu.matmul %109, %111, %cst_51 {dimension_numbers = #tpu.dot_dimension_numbers<[1], [0], [0], [1], [0, 0, 1, 1], [], []>} : vector<8x32xf32>, vector<32x64xf32>, vector<8x64xf32> -> vector<8x64xf32>
    %c0_52 = arith.constant 0 : index
    %c0_53 = arith.constant 0 : index
    %c0_54 = arith.constant 0 : index
    %113 = vector.load %arg12[%c0_52, %c0_53, %c0_54] : memref<2x1x64xf32, #tpu.memory_space<vmem>>, vector<1x1x64xf32>
    %114 = vector.shape_cast %113 : vector<1x1x64xf32> to vector<1x64xf32>
    %115 = vector.broadcast %114 : vector<1x64xf32> to vector<8x64xf32>
    %116 = arith.addf %112, %115 : vector<8x64xf32>
    %cst_55 = arith.constant 5.000000e-01 : f32
    %117 = vector.broadcast %cst_55 : f32 to vector<8x64xf32>
    %118 = arith.mulf %117, %116 : vector<8x64xf32>
    %cst_56 = arith.constant 0.707106769 : f32
    %119 = vector.broadcast %cst_56 : f32 to vector<8x64xf32>
    %120 = arith.mulf %116, %119 : vector<8x64xf32>
    %121 = math.erf %120 : vector<8x64xf32>
    %cst_57 = arith.constant 1.000000e+00 : f32
    %122 = vector.broadcast %cst_57 : f32 to vector<8x64xf32>
    %123 = arith.addf %122, %121 : vector<8x64xf32>
    %124 = arith.mulf %118, %123 : vector<8x64xf32>
    %c0_58 = arith.constant 0 : index
    %c0_59 = arith.constant 0 : index
    %c0_60 = arith.constant 0 : index
    %125 = vector.load %arg13[%c0_58, %c0_59, %c0_60] : memref<2x64x32xf32, #tpu.memory_space<vmem>>, vector<1x64x32xf32>
    %126 = vector.shape_cast %125 : vector<1x64x32xf32> to vector<64x32xf32>
    %cst_61 = arith.constant dense<0.000000e+00> : vector<8x32xf32>
    %127 = tpu.matmul %124, %126, %cst_61 {dimension_numbers = #tpu.dot_dimension_numbers<[1], [0], [0], [1], [0, 0, 1, 1], [], []>} : vector<8x64xf32>, vector<64x32xf32>, vector<8x32xf32> -> vector<8x32xf32>
    %c0_62 = arith.constant 0 : index
    %c0_63 = arith.constant 0 : index
    %c0_64 = arith.constant 0 : index
    %128 = vector.load %arg14[%c0_62, %c0_63, %c0_64] : memref<2x1x32xf32, #tpu.memory_space<vmem>>, vector<1x1x32xf32>
    %129 = vector.shape_cast %128 : vector<1x1x32xf32> to vector<1x32xf32>
    %130 = vector.broadcast %129 : vector<1x32xf32> to vector<8x32xf32>
    %131 = arith.addf %127, %130 : vector<8x32xf32>
    %132 = arith.addf %131, %109 : vector<8x32xf32>
    %c0_65 = arith.constant 0 : index
    %c0_66 = arith.constant 0 : index
    %c0_67 = arith.constant 0 : index
    %133 = vector.load %arg15[%c0_65, %c0_66, %c0_67] : memref<2x1x32xf32, #tpu.memory_space<vmem>>, vector<1x1x32xf32>
    %134 = vector.shape_cast %133 : vector<1x1x32xf32> to vector<1x32xf32>
    %c0_68 = arith.constant 0 : index
    %c0_69 = arith.constant 0 : index
    %c0_70 = arith.constant 0 : index
    %135 = vector.load %arg16[%c0_68, %c0_69, %c0_70] : memref<2x1x32xf32, #tpu.memory_space<vmem>>, vector<1x1x32xf32>
    %136 = vector.shape_cast %135 : vector<1x1x32xf32> to vector<1x32xf32>
    %cst_71 = arith.constant dense<0.000000e+00> : vector<8xf32>
    %137 = vector.multi_reduction <add>, %132, %cst_71 [1] : vector<8x32xf32> to vector<8xf32>
    %138 = vector.shape_cast %137 : vector<8xf32> to vector<8x1xf32>
    %cst_72 = arith.constant 3.200000e+01 : f32
    %139 = vector.broadcast %cst_72 : f32 to vector<8x1xf32>
    %140 = arith.divf %138, %139 : vector<8x1xf32>
    %141 = vector.broadcast %140 : vector<8x1xf32> to vector<8x32xf32>
    %142 = arith.subf %132, %141 : vector<8x32xf32>
    %143 = arith.mulf %142, %142 : vector<8x32xf32>
    %cst_73 = arith.constant dense<0.000000e+00> : vector<8xf32>
    %144 = vector.multi_reduction <add>, %143, %cst_73 [1] : vector<8x32xf32> to vector<8xf32>
    %145 = vector.shape_cast %144 : vector<8xf32> to vector<8x1xf32>
    %cst_74 = arith.constant 3.200000e+01 : f32
    %146 = vector.broadcast %cst_74 : f32 to vector<8x1xf32>
    %147 = arith.divf %145, %146 : vector<8x1xf32>
    %148 = vector.broadcast %140 : vector<8x1xf32> to vector<8x32xf32>
    %149 = arith.subf %132, %148 : vector<8x32xf32>
    %cst_75 = arith.constant 9.99999996E-13 : f32
    %150 = vector.broadcast %cst_75 : f32 to vector<8x1xf32>
    %151 = arith.addf %147, %150 : vector<8x1xf32>
    %152 = math.rsqrt %151 : vector<8x1xf32>
    %153 = vector.broadcast %152 : vector<8x1xf32> to vector<8x32xf32>
    %154 = arith.mulf %149, %153 : vector<8x32xf32>
    %155 = vector.broadcast %134 : vector<1x32xf32> to vector<8x32xf32>
    %156 = arith.mulf %154, %155 : vector<8x32xf32>
    %157 = vector.broadcast %136 : vector<1x32xf32> to vector<8x32xf32>
    %158 = arith.addf %156, %157 : vector<8x32xf32>
    %c1 = arith.constant 1 : index
    %c0_76 = arith.constant 0 : index
    %c0_77 = arith.constant 0 : index
    %159 = vector.load %arg5[%c1, %c0_76, %c0_77] : memref<2x32x96xf32, #tpu.memory_space<vmem>>, vector<1x32x96xf32>
    %160 = vector.shape_cast %159 : vector<1x32x96xf32> to vector<32x96xf32>
    %cst_78 = arith.constant dense<0.000000e+00> : vector<8x96xf32>
    %161 = tpu.matmul %158, %160, %cst_78 {dimension_numbers = #tpu.dot_dimension_numbers<[1], [0], [0], [1], [0, 0, 1, 1], [], []>} : vector<8x32xf32>, vector<32x96xf32>, vector<8x96xf32> -> vector<8x96xf32>
    %c1_79 = arith.constant 1 : index
    %c0_80 = arith.constant 0 : index
    %c0_81 = arith.constant 0 : index
    %162 = vector.load %arg6[%c1_79, %c0_80, %c0_81] : memref<2x1x96xf32, #tpu.memory_space<vmem>>, vector<1x1x96xf32>
    %163 = vector.shape_cast %162 : vector<1x1x96xf32> to vector<1x96xf32>
    %164 = vector.broadcast %163 : vector<1x96xf32> to vector<8x96xf32>
    %165 = arith.addf %161, %164 : vector<8x96xf32>
    %166 = vector.extract_strided_slice %165 {offsets = [0, 0], sizes = [8, 16], strides = [1, 1]} : vector<8x96xf32> to vector<8x16xf32>
    %167 = vector.extract_strided_slice %165 {offsets = [0, 32], sizes = [8, 16], strides = [1, 1]} : vector<8x96xf32> to vector<8x16xf32>
    %168 = vector.extract_strided_slice %165 {offsets = [0, 64], sizes = [8, 16], strides = [1, 1]} : vector<8x96xf32> to vector<8x16xf32>
    %169 = tpu.transpose %167, [1, 0] : vector<8x16xf32> -> vector<16x8xf32>
    %cst_82 = arith.constant dense<0.000000e+00> : vector<8x8xf32>
    %170 = tpu.matmul %166, %169, %cst_82 {dimension_numbers = #tpu.dot_dimension_numbers<[1], [0], [0], [1], [0, 0, 1, 1], [], []>} : vector<8x16xf32>, vector<16x8xf32>, vector<8x8xf32> -> vector<8x8xf32>
    %cst_83 = arith.constant 2.500000e-01 : f32
    %171 = vector.broadcast %cst_83 : f32 to vector<8x8xf32>
    %172 = arith.mulf %170, %171 : vector<8x8xf32>
    %173 = vector.broadcast %27 : vector<1x8xf32> to vector<8x8xf32>
    %174 = arith.addf %172, %173 : vector<8x8xf32>
    %cst_84 = arith.constant dense<0xFF800000> : vector<8xf32>
    %175 = vector.multi_reduction <maximumf>, %174, %cst_84 [1] : vector<8x8xf32> to vector<8xf32>
    %176 = vector.shape_cast %175 : vector<8xf32> to vector<8x1xf32>
    %177 = vector.broadcast %176 : vector<8x1xf32> to vector<8x8xf32>
    %178 = arith.subf %174, %177 : vector<8x8xf32>
    %179 = math.exp %178 : vector<8x8xf32>
    %cst_85 = arith.constant dense<0.000000e+00> : vector<8xf32>
    %180 = vector.multi_reduction <add>, %179, %cst_85 [1] : vector<8x8xf32> to vector<8xf32>
    %181 = vector.shape_cast %180 : vector<8xf32> to vector<8x1xf32>
    %182 = tpu.reciprocal %181 : vector<8x1xf32> -> vector<8x1xf32>
    %183 = vector.broadcast %182 : vector<8x1xf32> to vector<8x8xf32>
    %184 = arith.mulf %179, %183 : vector<8x8xf32>
    %cst_86 = arith.constant dense<0.000000e+00> : vector<8x16xf32>
    %185 = tpu.matmul %184, %168, %cst_86 {dimension_numbers = #tpu.dot_dimension_numbers<[1], [0], [0], [1], [0, 0, 1, 1], [], []>} : vector<8x8xf32>, vector<8x16xf32>, vector<8x16xf32> -> vector<8x16xf32>
    %186 = vector.extract_strided_slice %165 {offsets = [0, 16], sizes = [8, 16], strides = [1, 1]} : vector<8x96xf32> to vector<8x16xf32>
    %187 = vector.extract_strided_slice %165 {offsets = [0, 48], sizes = [8, 16], strides = [1, 1]} : vector<8x96xf32> to vector<8x16xf32>
    %188 = vector.extract_strided_slice %165 {offsets = [0, 80], sizes = [8, 16], strides = [1, 1]} : vector<8x96xf32> to vector<8x16xf32>
    %189 = tpu.transpose %187, [1, 0] : vector<8x16xf32> -> vector<16x8xf32>
    %cst_87 = arith.constant dense<0.000000e+00> : vector<8x8xf32>
    %190 = tpu.matmul %186, %189, %cst_87 {dimension_numbers = #tpu.dot_dimension_numbers<[1], [0], [0], [1], [0, 0, 1, 1], [], []>} : vector<8x16xf32>, vector<16x8xf32>, vector<8x8xf32> -> vector<8x8xf32>
    %cst_88 = arith.constant 2.500000e-01 : f32
    %191 = vector.broadcast %cst_88 : f32 to vector<8x8xf32>
    %192 = arith.mulf %190, %191 : vector<8x8xf32>
    %193 = vector.broadcast %27 : vector<1x8xf32> to vector<8x8xf32>
    %194 = arith.addf %192, %193 : vector<8x8xf32>
    %cst_89 = arith.constant dense<0xFF800000> : vector<8xf32>
    %195 = vector.multi_reduction <maximumf>, %194, %cst_89 [1] : vector<8x8xf32> to vector<8xf32>
    %196 = vector.shape_cast %195 : vector<8xf32> to vector<8x1xf32>
    %197 = vector.broadcast %196 : vector<8x1xf32> to vector<8x8xf32>
    %198 = arith.subf %194, %197 : vector<8x8xf32>
    %199 = math.exp %198 : vector<8x8xf32>
    %cst_90 = arith.constant dense<0.000000e+00> : vector<8xf32>
    %200 = vector.multi_reduction <add>, %199, %cst_90 [1] : vector<8x8xf32> to vector<8xf32>
    %201 = vector.shape_cast %200 : vector<8xf32> to vector<8x1xf32>
    %202 = tpu.reciprocal %201 : vector<8x1xf32> -> vector<8x1xf32>
    %203 = vector.broadcast %202 : vector<8x1xf32> to vector<8x8xf32>
    %204 = arith.mulf %199, %203 : vector<8x8xf32>
    %cst_91 = arith.constant dense<0.000000e+00> : vector<8x16xf32>
    %205 = tpu.matmul %204, %188, %cst_91 {dimension_numbers = #tpu.dot_dimension_numbers<[1], [0], [0], [1], [0, 0, 1, 1], [], []>} : vector<8x8xf32>, vector<8x16xf32>, vector<8x16xf32> -> vector<8x16xf32>
    %206 = tpu.concatenate %185, %205 in 1 : vector<8x16xf32>, vector<8x16xf32> -> vector<8x32xf32>
    %c1_92 = arith.constant 1 : index
    %c0_93 = arith.constant 0 : index
    %c0_94 = arith.constant 0 : index
    %207 = vector.load %arg7[%c1_92, %c0_93, %c0_94] : memref<2x32x32xf32, #tpu.memory_space<vmem>>, vector<1x32x32xf32>
    %208 = vector.shape_cast %207 : vector<1x32x32xf32> to vector<32x32xf32>
    %cst_95 = arith.constant dense<0.000000e+00> : vector<8x32xf32>
    %209 = tpu.matmul %206, %208, %cst_95 {dimension_numbers = #tpu.dot_dimension_numbers<[1], [0], [0], [1], [0, 0, 1, 1], [], []>} : vector<8x32xf32>, vector<32x32xf32>, vector<8x32xf32> -> vector<8x32xf32>
    %c1_96 = arith.constant 1 : index
    %c0_97 = arith.constant 0 : index
    %c0_98 = arith.constant 0 : index
    %210 = vector.load %arg8[%c1_96, %c0_97, %c0_98] : memref<2x1x32xf32, #tpu.memory_space<vmem>>, vector<1x1x32xf32>
    %211 = vector.shape_cast %210 : vector<1x1x32xf32> to vector<1x32xf32>
    %212 = vector.broadcast %211 : vector<1x32xf32> to vector<8x32xf32>
    %213 = arith.addf %209, %212 : vector<8x32xf32>
    %214 = arith.addf %213, %158 : vector<8x32xf32>
    %c1_99 = arith.constant 1 : index
    %c0_100 = arith.constant 0 : index
    %c0_101 = arith.constant 0 : index
    %215 = vector.load %arg9[%c1_99, %c0_100, %c0_101] : memref<2x1x32xf32, #tpu.memory_space<vmem>>, vector<1x1x32xf32>
    %216 = vector.shape_cast %215 : vector<1x1x32xf32> to vector<1x32xf32>
    %c1_102 = arith.constant 1 : index
    %c0_103 = arith.constant 0 : index
    %c0_104 = arith.constant 0 : index
    %217 = vector.load %arg10[%c1_102, %c0_103, %c0_104] : memref<2x1x32xf32, #tpu.memory_space<vmem>>, vector<1x1x32xf32>
    %218 = vector.shape_cast %217 : vector<1x1x32xf32> to vector<1x32xf32>
    %cst_105 = arith.constant dense<0.000000e+00> : vector<8xf32>
    %219 = vector.multi_reduction <add>, %214, %cst_105 [1] : vector<8x32xf32> to vector<8xf32>
    %220 = vector.shape_cast %219 : vector<8xf32> to vector<8x1xf32>
    %cst_106 = arith.constant 3.200000e+01 : f32
    %221 = vector.broadcast %cst_106 : f32 to vector<8x1xf32>
    %222 = arith.divf %220, %221 : vector<8x1xf32>
    %223 = vector.broadcast %222 : vector<8x1xf32> to vector<8x32xf32>
    %224 = arith.subf %214, %223 : vector<8x32xf32>
    %225 = arith.mulf %224, %224 : vector<8x32xf32>
    %cst_107 = arith.constant dense<0.000000e+00> : vector<8xf32>
    %226 = vector.multi_reduction <add>, %225, %cst_107 [1] : vector<8x32xf32> to vector<8xf32>
    %227 = vector.shape_cast %226 : vector<8xf32> to vector<8x1xf32>
    %cst_108 = arith.constant 3.200000e+01 : f32
    %228 = vector.broadcast %cst_108 : f32 to vector<8x1xf32>
    %229 = arith.divf %227, %228 : vector<8x1xf32>
    %230 = vector.broadcast %222 : vector<8x1xf32> to vector<8x32xf32>
    %231 = arith.subf %214, %230 : vector<8x32xf32>
    %cst_109 = arith.constant 9.99999996E-13 : f32
    %232 = vector.broadcast %cst_109 : f32 to vector<8x1xf32>
    %233 = arith.addf %229, %232 : vector<8x1xf32>
    %234 = math.rsqrt %233 : vector<8x1xf32>
    %235 = vector.broadcast %234 : vector<8x1xf32> to vector<8x32xf32>
    %236 = arith.mulf %231, %235 : vector<8x32xf32>
    %237 = vector.broadcast %216 : vector<1x32xf32> to vector<8x32xf32>
    %238 = arith.mulf %236, %237 : vector<8x32xf32>
    %239 = vector.broadcast %218 : vector<1x32xf32> to vector<8x32xf32>
    %240 = arith.addf %238, %239 : vector<8x32xf32>
    %c1_110 = arith.constant 1 : index
    %c0_111 = arith.constant 0 : index
    %c0_112 = arith.constant 0 : index
    %241 = vector.load %arg11[%c1_110, %c0_111, %c0_112] : memref<2x32x64xf32, #tpu.memory_space<vmem>>, vector<1x32x64xf32>
    %242 = vector.shape_cast %241 : vector<1x32x64xf32> to vector<32x64xf32>
    %cst_113 = arith.constant dense<0.000000e+00> : vector<8x64xf32>
    %243 = tpu.matmul %240, %242, %cst_113 {dimension_numbers = #tpu.dot_dimension_numbers<[1], [0], [0], [1], [0, 0, 1, 1], [], []>} : vector<8x32xf32>, vector<32x64xf32>, vector<8x64xf32> -> vector<8x64xf32>
    %c1_114 = arith.constant 1 : index
    %c0_115 = arith.constant 0 : index
    %c0_116 = arith.constant 0 : index
    %244 = vector.load %arg12[%c1_114, %c0_115, %c0_116] : memref<2x1x64xf32, #tpu.memory_space<vmem>>, vector<1x1x64xf32>
    %245 = vector.shape_cast %244 : vector<1x1x64xf32> to vector<1x64xf32>
    %246 = vector.broadcast %245 : vector<1x64xf32> to vector<8x64xf32>
    %247 = arith.addf %243, %246 : vector<8x64xf32>
    %cst_117 = arith.constant 5.000000e-01 : f32
    %248 = vector.broadcast %cst_117 : f32 to vector<8x64xf32>
    %249 = arith.mulf %248, %247 : vector<8x64xf32>
    %cst_118 = arith.constant 0.707106769 : f32
    %250 = vector.broadcast %cst_118 : f32 to vector<8x64xf32>
    %251 = arith.mulf %247, %250 : vector<8x64xf32>
    %252 = math.erf %251 : vector<8x64xf32>
    %cst_119 = arith.constant 1.000000e+00 : f32
    %253 = vector.broadcast %cst_119 : f32 to vector<8x64xf32>
    %254 = arith.addf %253, %252 : vector<8x64xf32>
    %255 = arith.mulf %249, %254 : vector<8x64xf32>
    %c1_120 = arith.constant 1 : index
    %c0_121 = arith.constant 0 : index
    %c0_122 = arith.constant 0 : index
    %256 = vector.load %arg13[%c1_120, %c0_121, %c0_122] : memref<2x64x32xf32, #tpu.memory_space<vmem>>, vector<1x64x32xf32>
    %257 = vector.shape_cast %256 : vector<1x64x32xf32> to vector<64x32xf32>
    %cst_123 = arith.constant dense<0.000000e+00> : vector<8x32xf32>
    %258 = tpu.matmul %255, %257, %cst_123 {dimension_numbers = #tpu.dot_dimension_numbers<[1], [0], [0], [1], [0, 0, 1, 1], [], []>} : vector<8x64xf32>, vector<64x32xf32>, vector<8x32xf32> -> vector<8x32xf32>
    %c1_124 = arith.constant 1 : index
    %c0_125 = arith.constant 0 : index
    %c0_126 = arith.constant 0 : index
    %259 = vector.load %arg14[%c1_124, %c0_125, %c0_126] : memref<2x1x32xf32, #tpu.memory_space<vmem>>, vector<1x1x32xf32>
    %260 = vector.shape_cast %259 : vector<1x1x32xf32> to vector<1x32xf32>
    %261 = vector.broadcast %260 : vector<1x32xf32> to vector<8x32xf32>
    %262 = arith.addf %258, %261 : vector<8x32xf32>
    %263 = arith.addf %262, %240 : vector<8x32xf32>
    %c1_127 = arith.constant 1 : index
    %c0_128 = arith.constant 0 : index
    %c0_129 = arith.constant 0 : index
    %264 = vector.load %arg15[%c1_127, %c0_128, %c0_129] : memref<2x1x32xf32, #tpu.memory_space<vmem>>, vector<1x1x32xf32>
    %265 = vector.shape_cast %264 : vector<1x1x32xf32> to vector<1x32xf32>
    %c1_130 = arith.constant 1 : index
    %c0_131 = arith.constant 0 : index
    %c0_132 = arith.constant 0 : index
    %266 = vector.load %arg16[%c1_130, %c0_131, %c0_132] : memref<2x1x32xf32, #tpu.memory_space<vmem>>, vector<1x1x32xf32>
    %267 = vector.shape_cast %266 : vector<1x1x32xf32> to vector<1x32xf32>
    %cst_133 = arith.constant dense<0.000000e+00> : vector<8xf32>
    %268 = vector.multi_reduction <add>, %263, %cst_133 [1] : vector<8x32xf32> to vector<8xf32>
    %269 = vector.shape_cast %268 : vector<8xf32> to vector<8x1xf32>
    %cst_134 = arith.constant 3.200000e+01 : f32
    %270 = vector.broadcast %cst_134 : f32 to vector<8x1xf32>
    %271 = arith.divf %269, %270 : vector<8x1xf32>
    %272 = vector.broadcast %271 : vector<8x1xf32> to vector<8x32xf32>
    %273 = arith.subf %263, %272 : vector<8x32xf32>
    %274 = arith.mulf %273, %273 : vector<8x32xf32>
    %cst_135 = arith.constant dense<0.000000e+00> : vector<8xf32>
    %275 = vector.multi_reduction <add>, %274, %cst_135 [1] : vector<8x32xf32> to vector<8xf32>
    %276 = vector.shape_cast %275 : vector<8xf32> to vector<8x1xf32>
    %cst_136 = arith.constant 3.200000e+01 : f32
    %277 = vector.broadcast %cst_136 : f32 to vector<8x1xf32>
    %278 = arith.divf %276, %277 : vector<8x1xf32>
    %279 = vector.broadcast %271 : vector<8x1xf32> to vector<8x32xf32>
    %280 = arith.subf %263, %279 : vector<8x32xf32>
    %cst_137 = arith.constant 9.99999996E-13 : f32
    %281 = vector.broadcast %cst_137 : f32 to vector<8x1xf32>
    %282 = arith.addf %278, %281 : vector<8x1xf32>
    %283 = math.rsqrt %282 : vector<8x1xf32>
    %284 = vector.broadcast %283 : vector<8x1xf32> to vector<8x32xf32>
    %285 = arith.mulf %280, %284 : vector<8x32xf32>
    %286 = vector.broadcast %265 : vector<1x32xf32> to vector<8x32xf32>
    %287 = arith.mulf %285, %286 : vector<8x32xf32>
    %288 = vector.broadcast %267 : vector<1x32xf32> to vector<8x32xf32>
    %289 = arith.addf %287, %288 : vector<8x32xf32>
    %290 = vector.extract_strided_slice %289 {offsets = [0, 0], sizes = [1, 32], strides = [1, 1]} : vector<8x32xf32> to vector<1x32xf32>
    %c0_138 = arith.constant 0 : index
    %c0_139 = arith.constant 0 : index
    %291 = vector.load %arg17[%c0_138, %c0_139] : memref<32x32xf32, #tpu.memory_space<vmem>>, vector<32x32xf32>
    %cst_140 = arith.constant dense<0.000000e+00> : vector<1x32xf32>
    %292 = tpu.matmul %290, %291, %cst_140 {dimension_numbers = #tpu.dot_dimension_numbers<[1], [0], [0], [1], [0, 0, 1, 1], [], []>} : vector<1x32xf32>, vector<32x32xf32>, vector<1x32xf32> -> vector<1x32xf32>
    %c0_141 = arith.constant 0 : index
    %c0_142 = arith.constant 0 : index
    %293 = vector.load %arg18[%c0_141, %c0_142] : memref<1x32xf32, #tpu.memory_space<vmem>>, vector<1x32xf32>
    %294 = arith.addf %292, %293 : vector<1x32xf32>
    %295 = math.tanh %294 : vector<1x32xf32>
    %c0_143 = arith.constant 0 : index
    %c0_144 = arith.constant 0 : index
    %296 = vector.load %arg19[%c0_143, %c0_144] : memref<32x9xf32, #tpu.memory_space<vmem>>, vector<32x9xf32>
    %cst_145 = arith.constant dense<0.000000e+00> : vector<1x9xf32>
    %297 = tpu.matmul %295, %296, %cst_145 {dimension_numbers = #tpu.dot_dimension_numbers<[1], [0], [0], [1], [0, 0, 1, 1], [], []>} : vector<1x32xf32>, vector<32x9xf32>, vector<1x9xf32> -> vector<1x9xf32>
    %c0_146 = arith.constant 0 : index
    %c0_147 = arith.constant 0 : index
    %298 = vector.load %arg20[%c0_146, %c0_147] : memref<1x9xf32, #tpu.memory_space<vmem>>, vector<1x9xf32>
    %299 = arith.addf %297, %298 : vector<1x9xf32>
    %c0_148 = arith.constant 0 : index
    %c0_149 = arith.constant 0 : index
    %c0_150 = arith.constant 0 : index
    %300 = vector.load %arg21[%c0_148, %c0_149, %c0_150] : memref<1x1x9xf32, #tpu.memory_space<vmem>>, vector<1x1x9xf32>
    %301 = vector.shape_cast %300 : vector<1x1x9xf32> to vector<1x9xf32>
    %302 = vector.shape_cast %299 : vector<1x9xf32> to vector<1x1x9xf32>
    tpu.vector_store %arg21[%c0_148, %c0_149, %c0_150], %302 {strides = array<i32>} : memref<1x1x9xf32, #tpu.memory_space<vmem>>, vector<1x1x9xf32>,
    return
  }
  func.func @transform_0(%arg0: i32) -> (i32, i32, i32) {
    %c0_i32 = arith.constant 0 : i32
    %c0_i32_0 = arith.constant 0 : i32
    %c0_i32_1 = arith.constant 0 : i32
    return %arg0, %c0_i32, %c0_i32_0 : i32, i32, i32
  }
  func.func @transform_1(%arg0: i32) -> (i32, i32, i32) {
    %c0_i32 = arith.constant 0 : i32
    %c0_i32_0 = arith.constant 0 : i32
    %c0_i32_1 = arith.constant 0 : i32
    return %arg0, %c0_i32, %c0_i32_0 : i32, i32, i32
  }
  func.func @transform_2(%arg0: i32) -> (i32, i32) {
    %c0_i32 = arith.constant 0 : i32
    %c0_i32_0 = arith.constant 0 : i32
    %c0_i32_1 = arith.constant 0 : i32
    return %c0_i32, %c0_i32_0 : i32, i32
  }
  func.func @transform_3(%arg0: i32) -> (i32, i32) {
    %c0_i32 = arith.constant 0 : i32
    %c0_i32_0 = arith.constant 0 : i32
    %c0_i32_1 = arith.constant 0 : i32
    return %c0_i32, %c0_i32_0 : i32, i32
  }
  func.func @transform_4(%arg0: i32) -> (i32, i32, i32) {
    %c0_i32 = arith.constant 0 : i32
    %c0_i32_0 = arith.constant 0 : i32
    %c0_i32_1 = arith.constant 0 : i32
    %c0_i32_2 = arith.constant 0 : i32
    return %c0_i32, %c0_i32_0, %c0_i32_1 : i32, i32, i32
  }
  func.func @transform_5(%arg0: i32) -> (i32, i32, i32) {
    %c0_i32 = arith.constant 0 : i32
    %c0_i32_0 = arith.constant 0 : i32
    %c0_i32_1 = arith.constant 0 : i32
    %c0_i32_2 = arith.constant 0 : i32
    return %c0_i32, %c0_i32_0, %c0_i32_1 : i32, i32, i32
  }
  func.func @transform_6(%arg0: i32) -> (i32, i32, i32) {
    %c0_i32 = arith.constant 0 : i32
    %c0_i32_0 = arith.constant 0 : i32
    %c0_i32_1 = arith.constant 0 : i32
    %c0_i32_2 = arith.constant 0 : i32
    return %c0_i32, %c0_i32_0, %c0_i32_1 : i32, i32, i32
  }
  func.func @transform_7(%arg0: i32) -> (i32, i32, i32) {
    %c0_i32 = arith.constant 0 : i32
    %c0_i32_0 = arith.constant 0 : i32
    %c0_i32_1 = arith.constant 0 : i32
    %c0_i32_2 = arith.constant 0 : i32
    return %c0_i32, %c0_i32_0, %c0_i32_1 : i32, i32, i32
  }
  func.func @transform_8(%arg0: i32) -> (i32, i32, i32) {
    %c0_i32 = arith.constant 0 : i32
    %c0_i32_0 = arith.constant 0 : i32
    %c0_i32_1 = arith.constant 0 : i32
    %c0_i32_2 = arith.constant 0 : i32
    return %c0_i32, %c0_i32_0, %c0_i32_1 : i32, i32, i32
  }
  func.func @transform_9(%arg0: i32) -> (i32, i32, i32) {
    %c0_i32 = arith.constant 0 : i32
    %c0_i32_0 = arith.constant 0 : i32
    %c0_i32_1 = arith.constant 0 : i32
    %c0_i32_2 = arith.constant 0 : i32
    return %c0_i32, %c0_i32_0, %c0_i32_1 : i32, i32, i32
  }
  func.func @transform_10(%arg0: i32) -> (i32, i32, i32) {
    %c0_i32 = arith.constant 0 : i32
    %c0_i32_0 = arith.constant 0 : i32
    %c0_i32_1 = arith.constant 0 : i32
    %c0_i32_2 = arith.constant 0 : i32
    return %c0_i32, %c0_i32_0, %c0_i32_1 : i32, i32, i32
  }
  func.func @transform_11(%arg0: i32) -> (i32, i32, i32) {
    %c0_i32 = arith.constant 0 : i32
    %c0_i32_0 = arith.constant 0 : i32
    %c0_i32_1 = arith.constant 0 : i32
    %c0_i32_2 = arith.constant 0 : i32
    return %c0_i32, %c0_i32_0, %c0_i32_1 : i32, i32, i32
  }
  func.func @transform_12(%arg0: i32) -> (i32, i32, i32) {
    %c0_i32 = arith.constant 0 : i32
    %c0_i32_0 = arith.constant 0 : i32
    %c0_i32_1 = arith.constant 0 : i32
    %c0_i32_2 = arith.constant 0 : i32
    return %c0_i32, %c0_i32_0, %c0_i32_1 : i32, i32, i32
  }
  func.func @transform_13(%arg0: i32) -> (i32, i32, i32) {
    %c0_i32 = arith.constant 0 : i32
    %c0_i32_0 = arith.constant 0 : i32
    %c0_i32_1 = arith.constant 0 : i32
    %c0_i32_2 = arith.constant 0 : i32
    return %c0_i32, %c0_i32_0, %c0_i32_1 : i32, i32, i32
  }
  func.func @transform_14(%arg0: i32) -> (i32, i32, i32) {
    %c0_i32 = arith.constant 0 : i32
    %c0_i32_0 = arith.constant 0 : i32
    %c0_i32_1 = arith.constant 0 : i32
    %c0_i32_2 = arith.constant 0 : i32
    return %c0_i32, %c0_i32_0, %c0_i32_1 : i32, i32, i32
  }
  func.func @transform_15(%arg0: i32) -> (i32, i32, i32) {
    %c0_i32 = arith.constant 0 : i32
    %c0_i32_0 = arith.constant 0 : i32
    %c0_i32_1 = arith.constant 0 : i32
    %c0_i32_2 = arith.constant 0 : i32
    return %c0_i32, %c0_i32_0, %c0_i32_1 : i32, i32, i32
  }
  func.func @transform_16(%arg0: i32) -> (i32, i32) {
    %c0_i32 = arith.constant 0 : i32
    %c0_i32_0 = arith.constant 0 : i32
    %c0_i32_1 = arith.constant 0 : i32
    return %c0_i32, %c0_i32_0 : i32, i32
  }
  func.func @transform_17(%arg0: i32) -> (i32, i32) {
    %c0_i32 = arith.constant 0 : i32
    %c0_i32_0 = arith.constant 0 : i32
    %c0_i32_1 = arith.constant 0 : i32
    return %c0_i32, %c0_i32_0 : i32, i32
  }
  func.func @transform_18(%arg0: i32) -> (i32, i32) {
    %c0_i32 = arith.constant 0 : i32
    %c0_i32_0 = arith.constant 0 : i32
    %c0_i32_1 = arith.constant 0 : i32
    return %c0_i32, %c0_i32_0 : i32, i32
  }
  func.func @transform_19(%arg0: i32) -> (i32, i32) {
    %c0_i32 = arith.constant 0 : i32
    %c0_i32_0 = arith.constant 0 : i32
    %c0_i32_1 = arith.constant 0 : i32
    return %c0_i32, %c0_i32_0 : i32, i32
  }
  func.func @transform_20(%arg0: i32) -> (i32, i32, i32) {
    %c0_i32 = arith.constant 0 : i32
    %c0_i32_0 = arith.constant 0 : i32
    %c0_i32_1 = arith.constant 0 : i32
    return %arg0, %c0_i32, %c0_i32_0 : i32, i32, i32
  }
}

</mosaic_0001>

<bundles_post_ra>
// kernel: open_entity_forward.2
= control target key start
LH: loop header
LB: loop body
LE: loop exit
PB: predicated region body
PF: predicated region fallthrough
CT: control target
= control target key end

     0   :  { %v280_v0 = vmov 0.0   ;;  %vm32_vm0 = vcmask 261120   ;;  %vm281_vm1 = vmmov 0   ;;  %s282_s17 = smov 32   ;;  %s283_s18 = smov 96   ;;  %vm219_vm2 = vcmask 7168   ;;  %s364_s3 = inlined_call_operand.vmem [shape: f32[32,128], index: 3, kind: input, shape index: {}]   ;;  %s365_s0 = inlined_call_operand.vmem [shape: f32[8,32], index: 0, kind: input, shape index: {}]   ;;  %s366_s2 = inlined_call_operand.vmem [shape: f32[8,32], index: 2, kind: input, shape index: {}]   ;;  %s367_s1 = inlined_call_operand.vmem [shape: f32[8,32], index: 1, kind: input, shape index: {}]   ;;  %s368_s4 = inlined_call_operand.vmem [shape: f32[1,128], index: 4, kind: input, shape index: {}]   ;;  %s369_s5 = inlined_call_operand.vmem [shape: f32[1,128], index: 5, kind: input, shape index: {}]   ;;  %s370_s6 = inlined_call_operand.vmem [shape: f32[8,128], index: 6, kind: output, shape index: {0}]   ;;  %s371_s7 = inlined_call_operand.vmem [shape: f32[8,4], index: 7, kind: output, shape index: {1}]  }
   0x1   :  { %253 = vmatprep.subr.mxu0 %v280_v0  ;;  %264 = vmatprep.subr.mxu1 %v280_v0  ;;  %v31_v1 = vld [vmem:[%s364_s3 + $0x18] sm:$0xff]  ;;  %v30_v2 = vld [vmem:[%s364_s3 + $0x10] sm:$0xff]  ;;  %v29_v3 = vld [vmem:[%s364_s3 + $0x8] sm:$0xff]  ;;  %vm221_vm3 = vcmask 15360   ;;  %vm223_vm4 = vcmask 23552   ;;  %vm229_vm5 = vcmask 31744  }
   0x2   :  { %254 = vmatpush3.msra.mxu0 %v31_v1  ;;  %265 = vmatpush3.msra.mxu1 %v31_v1  ;;  %v25_v4 = vld [vmem:[%s365_s0] sm:$0xff] }
   0x3   :  { %255 = vmatprep.subr.mxu0 %v280_v0  ;;  %266 = vmatprep.subr.mxu1 %v280_v0  ;;  %v26_v5 = vld [vmem:[%s366_s2] sm:$0xff] }
   0x4   :  { %256 = vmatpush3.msra.mxu0 %v30_v2  ;;  %267 = vmatpush3.msra.mxu1 %v30_v2  ;;  %v28_v6 = vld [vmem:[%s364_s3] sm:$0xff]  ;;  %v27_v7 = vmul.f32 %v26_v5, %v25_v4 }
   0x5   :  { %257 = vmatprep.subr.mxu0 %v280_v0  ;;  %268 = vmatprep.subr.mxu1 %v280_v0  ;;  %v106_v8 = vld [vmem:[%s367_s1] sm:$0xff] }
   0x6   :  { %258 = vmatpush3.msra.mxu0 %v29_v3  ;;  %269 = vmatpush3.msra.mxu1 %v29_v3  ;;  %v241_v9 = vld [vmem:[%s368_s4] ss:$0 sm:$0xff]  ;;  %s284_s4 = smov 64  }
   0x7   :  { %259 = vmatprep.subr.mxu0 %v280_v0  ;;  %270 = vmatprep.subr.mxu1 %v280_v0  ;;  %v242_v10 = vld [vmem:[%s369_s5] ss:$0 sm:$0xff] }
   0x8   :  { %260 = vmatpush3.msra.mxu0 %v28_v6  ;;  %261 = vmatprep.mubr.msk.f32.mxu0 %vm281_vm1, %v280_v0 }
   0x9   :  { %271 = vmatpush3.msra.mxu1 %v28_v6  ;;  %272 = vmatprep.mubr.msk.f32.mxu1 %vm281_vm1, %v280_v0 }
   0xa   :  { %262 = vmatmul.mubr.msk.f32.vlgmr.msra.gmra.mxu0 %vm32_vm0, %v27_v7  ;;  %273 = vmatmul.mubr.msk.f32.vlgmr.msra.gmra.mxu1 %vm32_vm0, %v106_v8 }
  0xca   :  { %v102_v11 = vpop.f32.mrf.mxu0  ;;  %v176_v12 = vpop.f32.mrf.mxu1 }
  0xcb   :  { %v187_v13 = vmul.f32 %v241_v9, %v102_v11  ;;  %225 = vst [vmem:[%s370_s6] sm:$0xff] %v102_v11  ;;  %v195_v14 = vmul.f32 %v242_v10, %v176_v12 }
  0xcc   :  { %v263_v15 = vpop.f32.mrf.mxu0  ;;  %v274_v16 = vpop.f32.mrf.mxu1 }
  0xcd   :  { %v196_v17 = vadd.f32 %v195_v14, %v187_v13 }
  0xcf   :  { %213 = vrot.lane.b32.xlu1 %v196_v17, %s282_s17  ;;  %201 = vrot.lane.b32.xlu0 %v196_v17, %s283_s18  ;;  %v197_v18 = vsel %vm32_vm0, %v196_v17, 0.0 }
  0xd3   :  { %207 = vrot.lane.b32.xlu0 %v196_v17, %s284_s4 }
  0xf3   :  { %198 = vadd.xlane.f32.xlu1 %v197_v18 }
 0x141   :  { %v214_v19 = vpop.permute.xlu1 %213  ;;  %v202_v20 = vpop.permute.xlu0 %201 }
 0x142   :  { %v204_v21 = vsel %vm32_vm0, %v202_v20, 0.0  ;;  %v216_v22 = vsel %vm32_vm0, %v214_v19, 0.0 }
 0x143   :  { %205 = vadd.xlane.f32.xlu0 %v204_v21  ;;  %217 = vadd.xlane.f32.xlu1 %v216_v22 }
 0x145   :  { %v208_v23 = vpop.permute.xlu0 %207 }
 0x146   :  { %v210_v24 = vsel %vm32_vm0, %v208_v23, 0.0 }
 0x147   :  { %211 = vadd.xlane.f32.xlu0 %v210_v24 }
 0x17c   :  { %v199_v26 = vpop.xlane.xlu1 %198 }
 0x1cc   :  { %v206_v25 = vpop.xlane.xlu0 %205  ;;  %v218_v29 = vpop.xlane.xlu1 %217 }
 0x1cd   :  { %v220_v27 = vsel %vm219_vm2, %v199_v26, %v206_v25 }
 0x1d0   :  { %v212_v28 = vpop.xlane.xlu0 %211 }
 0x1d1   :  { %v222_v30 = vsel %vm221_vm3, %v220_v27, %v212_v28 }
 0x1d2   :  { %v224_v31 = vsel %vm223_vm4, %v222_v30, %v218_v29 }
 0x1d3   :  { %vm226_vm6 = vcmp.gt.f32.partialorder %v224_v31, 0.0  ;;  %v227_v32 = vmul.f32 0.01, %v224_v31 }
 0x1d5   :  { %v228_v33 = vsel %vm226_vm6, %v224_v31, %v227_v32 }
 0x1d6   :  { %230 = vst.msk [vmem:[%s371_s7] sm:$0xff] %vm229_vm5, %v228_v33 }

// kernel: open_entity_forward.3
= control target key start
LH: loop header
LB: loop body
LE: loop exit
PB: predicated region body
PF: predicated region fallthrough
CT: control target
= control target key end

     0   :  { %s3267_s0 = inlined_call_operand.vmem [shape: f32[2,8,32], index: 0, kind: input, shape index: {}]   ;;  %s3268_s1 = inlined_call_operand.vmem [shape: f32[2,1,8], index: 1, kind: input, shape index: {}]   ;;  %s3269_s2 = inlined_call_operand.vmem [shape: f32[1,32], index: 2, kind: input, shape index: {}]   ;;  %s3270_s3 = inlined_call_operand.vmem [shape: f32[1,32], index: 3, kind: input, shape index: {}]   ;;  %s3271_s4 = inlined_call_operand.vmem [shape: f32[2,32,96], index: 4, kind: input, shape index: {}]   ;;  %s3272_s5 = inlined_call_operand.vmem [shape: f32[2,1,96], index: 5, kind: input, shape index: {}]   ;;  %s3273_s6 = inlined_call_operand.vmem [shape: f32[2,32,32], index: 6, kind: input, shape index: {}]   ;;  %s3274_s7 = inlined_call_operand.vmem [shape: f32[2,1,32], index: 7, kind: input, shape index: {}]   ;;  %s3275_s8 = inlined_call_operand.vmem [shape: f32[2,1,32], index: 8, kind: input, shape index: {}]   ;;  %s3276_s9 = inlined_call_operand.vmem [shape: f32[2,1,32], index: 9, kind: input, shape index: {}]   ;;  %s3277_s10 = inlined_call_operand.vmem [shape: f32[2,32,64], index: 10, kind: input, shape index: {}]   ;;  %s3278_s11 = inlined_call_operand.vmem [shape: f32[2,1,64], index: 11, kind: input, shape index: {}]   ;;  %s3279_s12 = inlined_call_operand.vmem [shape: f32[2,64,32], index: 12, kind: input, shape index: {}]   ;;  %s3280_s13 = inlined_call_operand.vmem [shape: f32[2,1,32], index: 13, kind: input, shape index: {}]   ;;  %s3281_s14 = inlined_call_operand.vmem [shape: f32[2,1,32], index: 14, kind: input, shape index: {}]   ;;  %s3282_s15 = inlined_call_operand.vmem [shape: f32[2,1,32], index: 15, kind: input, shape index: {}]   ;;  %s3283_s16 = inlined_call_operand.vmem [shape: f32[32,32], index: 16, kind: input, shape index: {}]   ;;  %s3284_s17 = inlined_call_operand.vmem [shape: f32[1,32], index: 17, kind: input, shape index: {}]   ;;  %s3285_s18 = inlined_call_operand.vmem [shape: f32[32,9], index: 18, kind: input, shape index: {}]   ;;  %s3286_s19 = inlined_call_operand.vmem [shape: f32[1,9], index: 19, kind: input, shape index: {}]   ;;  %s3287_s20 = inlined_call_operand.vmem [shape: f32[2,1,9], index: 20, kind: output, shape index: {}]  }
   0x1   :  { %3291 = sst [smem:[#allocation2_spill]] %s3267_s0 }
   0x2   :  { %3292 = sst [smem:[#allocation3_spill]] %s3268_s1  ;;  %s2878_s1 = smov 0  }
   0x3   :  { %3293 = sst [smem:[#allocation4_spill]] %s3269_s2 }
   0x4   :  { %3294 = sst [smem:[#allocation5_spill]] %s3270_s3 }
   0x5   :  { %3295 = sst [smem:[#allocation6_spill]] %s3271_s4 }
   0x6 LB: > { %s2392_s22 = sadd.s32 4294967295, %s2763_s1   ;;  %p2396_p0 = scmp.ge.s32.totalorder %s2763_s1, 1  ;;  %s2763_s1 = sphi %s2878_s1, %s30_s1  }
   0x7   : > { %p569_p1 = scmp.lt.s32.totalorder %s2763_s1, 3 }
   0x9   : > { %p570_p2 = pnand %p2396_p0, %p569_p1 }
   0xa   : > { %p627_p3 = scmp.lt.s32.totalorder (!%p570_p2), %s2392_s22, 1  ;;  %s3296_s25 = sld [smem:[#allocation2_spill]] (!%p570_p2) }
   0xb   : > { %573 = sbr.rel (%p570_p2) target bundleno = 5453 (0x154d), region = 100  ;;  %s3297_s28 = sld [smem:[#allocation6_spill]] (!%p570_p2) }
   0xc   : > { %s3299_s27 = sld [smem:[#allocation5_spill]] (!%p570_p2)  ;;  %s2767_s30 = smov (!%p570_p2), 112  }
   0xd   : > { %s2768_s0 = smov (!%p570_p2), 96   ;;  %s2769_s21 = smov (!%p570_p2), 80  }
   0xe   : > { %s3300_s2 = sld [smem:[#allocation3_spill]] (!%p570_p2)  ;;  %s2771_s26 = smov (!%p570_p2), 64  }
   0xf   : > { %s3289_s4 = smov (!%p570_p2), 16  }
  0x10   : > { %s3304_s22 = smov (!%p627_p3, %s2392_s22), 1  ;;  %vm640_vm0 = vcmask 261120   ;;  %v2765_v8 = vmov 0.0   ;;  %vm2766_vm1 = vmmov 0   ;;  %v2400_v21 = vld [vmem:[%s3272_s5] ss:$0 sm:$0xff] }
  0x11   : > { %s2397_s23 = sshll.u32 %s3304_s22, 3  ;;  %v673_v7 = vld [vmem:[%s3297_s28 + $0x18] sm:$0xff]  ;;  %2543 = vmatprep.subr.mxu0 %v2765_v8  ;;  %v672_v9 = vld [vmem:[%s3297_s28 + $0x10] sm:$0xff]  ;;  %2551 = vmatprep.mubr.msk.f32.mxu0 %vm2766_vm1, %v2765_v8  ;;  %v671_v10 = vld [vmem:[%s3297_s28 + $0x8] sm:$0xff]  ;;  %vm757_vm2 = vcmask 130048   ;;  %vm840_vm3 = vcmask 64512  }
  0x12   : > { %s630_s3 = scalar_lea.vmem %s3296_s25, %s2397_s23  ;;  %2544 = vmatpush3.msra.mxu0 %v673_v7  ;;  %2554 = vmatprep.subr.mxu1 %v2765_v8  ;;  %v670_v11 = vld [vmem:[%s3297_s28] sm:$0xff]  ;;  %s3298_s25 = sld [smem:[#allocation4_spill]]  ;;  %v1103_v57 = vld [vmem:[%s3273_s6 + $0x18] sm:$0xff]  ;;  %v1102_v58 = vld [vmem:[%s3273_s6 + $0x10] sm:$0xff]  ;;  %vm1318_vm4 = vcmask 523264   ;;  %vm2334_vm5 = vcmask 65536  }
  0x13   : > { %v637_v0 = vld [vmem:[%s630_s3] sm:$0xff]  ;;  %2545 = vmatprep.subr.mxu0 %v2765_v8  ;;  %2556 = vmatprep.mubr.msk.f32.mxu1 %vm2766_vm1, %v2765_v8  ;;  %s3290_s3 = smov 48   ;;  %v1101_v59 = vld [vmem:[%s3273_s6 + $0x8] sm:$0xff] }
  0x14   : > { %v641_v1 = vsel %vm640_vm0, %v637_v0, 0.0  ;;  %2546 = vmatpush3.msra.mxu0 %v672_v9  ;;  %v2399_v18 = vld [vmem:[%s3299_s27] ss:$0 sm:$0xff]  ;;  %s3302_s27 = smov 16  }
  0x15   : > { %642 = vadd.xlane.f32.xlu0 %v641_v1  ;;  %2547 = vmatprep.subr.mxu0 %v2765_v8  ;;  %v1100_v60 = vld [vmem:[%s3273_s6] sm:$0xff] }
  0x16   : > { %2548 = vmatpush3.msra.mxu0 %v671_v10 }
  0x17   : > { %2549 = vmatprep.subr.mxu0 %v2765_v8 }
  0x18   : > { %2550 = vmatpush3.msra.mxu0 %v670_v11  ;;  %v2398_v16 = vld [vmem:[%s3298_s25] ss:$0 sm:$0xff]  ;;  %s633_s25 = scalar_lea.vmem %s3300_s2, %s3304_s22 }
  0x19   : > { %2564 = vmatprep.subr.mxu0 %v2765_v8  ;;  %v2948_v29 = vld [vmem:[%s633_s25] ss:$0 sm:$0xff] }
  0x9e   : > { %v643_v2 = vpop.xlane.xlu0 %642 }
  0x9f   : > { %v645_v3 = vmul.f32 0.03125, %v643_v2 }
  0xa1   : > { %v646_v4 = vsub.f32 %v637_v0, %v645_v3  ;;  %v2409_v3 = vld [vmem:[%s3274_s7] ss:$0 sm:$0xff] }
  0xa3   : > { %v647_v5 = vmul.f32 %v646_v4, %v646_v4 }
  0xa5   : > { %v648_v6 = vsel %vm640_vm0, %v647_v5, 0.0 }
  0xa6   : > { %649 = vadd.xlane.f32.xlu0 %v648_v6 }
 0x12f   : > { %v650_v12 = vpop.xlane.xlu0 %649 }
 0x130   : > { %v651_v13 = vmul.f32 0.03125, %v650_v12 }
 0x132   : > { %v652_v14 = vadd.f32 1e-12, %v651_v13 }
 0x134   : > { %2725 = vrsqrt.f32 %v652_v14 }
 0x141   : > { %v2726_v15 = vpop.eup %2725 }
 0x142   : > { %v654_v17 = vmul.f32 %v2726_v15, %v646_v4  ;;  %v1217_v15 = vld [vmem:[%s3277_s10 + $0x18] sm:$0xff] }
 0x144   : > { %v661_v19 = vmul.f32 %v2398_v16, %v654_v17  ;;  %v1216_v16 = vld [vmem:[%s3277_s10 + $0x10] sm:$0xff]  ;;  %v1215_v17 = vld [vmem:[%s3277_s10 + $0x8] sm:$0xff] }
 0x146   : > { %v2922_v20 = vadd.f32 %v2399_v18, %v661_v19  ;;  %v1214_v18 = vld [vmem:[%s3277_s10] sm:$0xff] }
 0x148   : > { %2552 = vmatmul.mubr.msk.f32.vlgmr.msra.gmra.mxu0 %vm640_vm0, %v2922_v20 }
 0x149   : > { %2566 = vmatprep.mubr.msk.f32.mxu0 %vm2766_vm1, %v2765_v8 }
 0x208   : > { %v750_v22 = vpop.f32.mrf.mxu0 }
 0x209   : > { %v751_v23 = vadd.f32 %v2400_v21, %v750_v22 }
 0x20a   : > { %v2553_v24 = vpop.f32.mrf.mxu0 }
 0x20b   : > { %928 = vrot.lane.b32.xlu0 %v751_v23, %s2767_s30  ;;  %755 = vrot.lane.b32.xlu1 %v751_v23, %s2768_s0 }
 0x20f   : > { %930 = vrot.lane.b32.xlu1 %v751_v23, %s2769_s21 }
 0x27d   : > { %v756_v25 = vpop.permute.xlu1 %755  ;;  %v929_v27 = vpop.permute.xlu0 %928 }
 0x27e   : > { %2555 = vmatpush3.xpose.msk.msra.mxu1 %vm757_vm2, %v756_v25  ;;  %v2412_v25 = vld [vmem:[%s3276_s9] ss:$0 sm:$0xff] }
 0x27f   : > { %2559 = vmatprep.subr.mxu1 %v2765_v8 }
 0x281   : > { %2557 = vmatmul.mubr.msk.f32.vlgmr.msra.gmra.mxu1 %vm757_vm2, %v751_v23  ;;  %v931_v26 = vpop.permute.xlu1 %930 }
 0x282   : > { %2565 = vmatpush3.xpose.msk.msra.mxu0 %vm757_vm2, %v931_v26  ;;  %2561 = vmatprep.mubr.msk.f32.mxu1 %vm2766_vm1, %v2765_v8 }
 0x283   : > { %2574 = vmatprep.subr.mxu0 %v2765_v8 }
 0x285   : > { %2567 = vmatmul.mubr.msk.f32.vlgmr.msra.gmra.mxu0 %vm757_vm2, %v929_v27 }
 0x286   : > { %2582 = vmatprep.mubr.msk.f32.mxu0 %vm2766_vm1, %v2765_v8  ;;  %2575 = vmatpush3.msra.mxu0 %v1103_v57  ;;  %v2422_v57 = vld [vmem:[%s3297_s28 + $0x38] sm:$0xff] }
 0x287   : > { %2576 = vmatprep.subr.mxu0 %v2765_v8 }
 0x288   : > { %2577 = vmatpush3.msra.mxu0 %v1102_v58  ;;  %v2421_v58 = vld [vmem:[%s3297_s28 + $0x30] sm:$0xff] }
 0x289   : > { %2578 = vmatprep.subr.mxu0 %v2765_v8 }
 0x28a   : > { %2579 = vmatpush3.msra.mxu0 %v1101_v59  ;;  %v2420_v59 = vld [vmem:[%s3297_s28 + $0x28] sm:$0xff] }
 0x28b   : > { %2580 = vmatprep.subr.mxu0 %v2765_v8 }
 0x28c   : > { %2581 = vmatpush3.msra.mxu0 %v1100_v60  ;;  %v2419_v60 = vld [vmem:[%s3297_s28 + $0x20] sm:$0xff] }
 0x28d   : > { %2596 = vmatprep.subr.mxu0 %v2765_v8 }
 0x341   : > { %v828_v28 = vpop.f32.mrf.mxu1 }
 0x342   : > { %v832_v30 = vmul.f32 0.25, %v828_v28  ;;  %v1310_v28 = vld [vmem:[%s3279_s12 + $0x38] sm:$0xff] }
 0x343   : > { %v2558_v31 = vpop.f32.mrf.mxu1 }
 0x344   : > { %v839_v32 = vadd.f32 %v2948_v29, %v832_v30  ;;  %v1309_v30 = vld [vmem:[%s3279_s12 + $0x30] sm:$0xff]  ;;  %v1308_v31 = vld [vmem:[%s3279_s12 + $0x28] sm:$0xff] }
 0x345   : > { %v1002_v33 = vpop.f32.mrf.mxu0 }
 0x346   : > { %v1006_v34 = vmul.f32 0.25, %v1002_v33  ;;  %v841_v35 = vsel %vm840_vm3, %v839_v32, -inf  ;;  %v1306_v33 = vld [vmem:[%s3279_s12 + $0x18] sm:$0xff] }
 0x347   : > { %842 = vmax.xlane.f32.xlu1 %v841_v35  ;;  %v2568_v36 = vpop.f32.mrf.mxu0  ;;  %v1304_v35 = vld [vmem:[%s3279_s12 + $0x8] sm:$0xff] }
 0x348   : > { %v1007_v37 = vadd.f32 %v2948_v29, %v1006_v34  ;;  %v1305_v34 = vld [vmem:[%s3279_s12 + $0x10] sm:$0xff]  ;;  %v1303_v36 = vld [vmem:[%s3279_s12] sm:$0xff] }
 0x34a   : > { %v1008_v38 = vsel %vm840_vm3, %v1007_v37, -inf }
 0x34b   : > { %1009 = vmax.xlane.f32.xlu0 %v1008_v38 }
 0x361   : > { %1019 = vrot.lane.b32.xlu0 %v751_v23, %s3290_s3  ;;  %s636_s3 = scalar_lea.vmem %s3287_s20, %s3304_s22 }
 0x3d0   : > { %v843_v39 = vpop.xlane.xlu1 %842 }
 0x3d1   : > { %v844_v40 = vsub.f32 %v839_v32, %v843_v39  ;;  %v1307_v32 = vld [vmem:[%s3279_s12 + $0x20] sm:$0xff] }
 0x3d3   : > { %v845_v41 = vmul.f32 1.442695, %v844_v40 }
 0x3d4   : > { %v1010_v42 = vpop.xlane.xlu0 %1009 }
 0x3d5   : > { %2727 = vpow2.f32 %v845_v41  ;;  %v1011_v43 = vsub.f32 %v1007_v37, %v1010_v42  ;;  %v2413_v37 = vld [vmem:[%s3278_s11] ss:$0 sm:$0xff] }
 0x3d7   : > { %v1012_v44 = vmul.f32 1.442695, %v1011_v43 }
 0x3d8   : > { %v1020_v54 = vpop.permute.xlu0 %1019 }
 0x3d9   : > { %2729 = vpow2.f32 %v1012_v44 }
 0x3e2   : > { %v2728_v45 = vpop.eup %2727 }
 0x3e3   : > { %v847_v46 = vsel %vm840_vm3, %v2728_v45, 0.0 }
 0x3e4   : > { %848 = vadd.xlane.f32.xlu1 %v847_v46  ;;  %v2415_v46 = vld [vmem:[%s3280_s13] ss:$0 sm:$0xff] }
 0x3e6   : > { %v2730_v47 = vpop.eup %2729 }
 0x3e7   : > { %v1014_v48 = vsel %vm840_vm3, %v2730_v47, 0.0 }
 0x3e8   : > { %1015 = vadd.xlane.f32.xlu1 %v1014_v48 }
 0x3f9   : > { %852 = vrot.lane.b32.xlu1 %v751_v23, %s2771_s26  ;;  %v2411_v23 = vld [vmem:[%s3275_s8] ss:$0 sm:$0xff] }
 0x46d   : > { %v849_v49 = vpop.xlane.xlu1 %848 }
 0x46e   : > { %2731 = vrcp.f32 %v849_v49 }
 0x471   : > { %v1016_v50 = vpop.xlane.xlu1 %1015 }
 0x472   : > { %2733 = vrcp.f32 %v1016_v50 }
 0x475   : > { %v853_v51 = vpop.permute.xlu1 %852 }
 0x476   : > { %2560 = vmatpush3.msra.mxu1 %v853_v51 }
 0x477   : > { %2569 = vmatprep.subr.mxu1 %v2765_v8 }
 0x47b   : > { %v2732_v52 = vpop.eup %2731 }
 0x47c   : > { %v851_v53 = vmul.f32 %v2732_v52, %v2728_v45 }
 0x47e   : > { %2562 = vmatmul.mubr.msk.f32.vlgmr.msra.gmra.mxu1 %vm840_vm3, %v851_v53 }
 0x47f   : > { %v2734_v55 = vpop.eup %2733  ;;  %2570 = vmatpush3.msra.mxu1 %v1020_v54  ;;  %2571 = vmatprep.mubr.msk.f32.mxu1 %vm2766_vm1, %v2765_v8 }
 0x480   : > { %v1018_v56 = vmul.f32 %v2734_v55, %v2730_v47  ;;  %2585 = vmatprep.subr.mxu1 %v2765_v8 }
 0x482   : > { %2572 = vmatmul.mubr.msk.f32.vlgmr.msra.gmra.mxu1 %vm840_vm3, %v1018_v56 }
 0x483   : > { %2593 = vmatprep.mubr.msk.f32.mxu1 %vm2766_vm1, %v2765_v8  ;;  %2586 = vmatpush3.msra.mxu1 %v1217_v15 }
 0x484   : > { %2587 = vmatprep.subr.mxu1 %v2765_v8 }
 0x485   : > { %2588 = vmatpush3.msra.mxu1 %v1216_v16 }
 0x486   : > { %2589 = vmatprep.subr.mxu1 %v2765_v8 }
 0x487   : > { %2590 = vmatpush3.msra.mxu1 %v1215_v17 }
 0x488   : > { %2591 = vmatprep.subr.mxu1 %v2765_v8 }
 0x489   : > { %2592 = vmatpush3.msra.mxu1 %v1214_v18 }
 0x48a   : > { %2615 = vmatprep.subr.mxu1 %v2765_v8 }
 0x53e   : > { %v924_v61 = vpop.f32.mrf.mxu1 }
 0x540   : > { %v2563_v62 = vpop.f32.mrf.mxu1 }
 0x542   : > { %v1091_v63 = vpop.f32.mrf.mxu1 }
 0x543   : > { %1096 = vrot.lane.b32.xlu1 %v1091_v63, %s3289_s4 }
 0x544   : > { %v2573_v0 = vpop.f32.mrf.mxu1 }
 0x5b5   : > { %v1097_v1 = vpop.permute.xlu1 %1096 }
 0x5b6   : > { %v1099_v2 = vsel %vm757_vm2, %v924_v61, %v1097_v1  ;;  %v2417_v1 = vld [vmem:[%s3281_s14] ss:$0 sm:$0xff] }
 0x5b7   : > { %2583 = vmatmul.mubr.msk.f32.vlgmr.msra.gmra.mxu0 %vm640_vm0, %v1099_v2 }
 0x5b8   : > { %2612 = vmatprep.mubr.msk.f32.mxu0 %vm2766_vm1, %v2765_v8  ;;  %2597 = vmatpush3.msra.mxu0 %v1310_v28 }
 0x5b9   : > { %2598 = vmatprep.subr.mxu0 %v2765_v8 }
 0x5ba   : > { %2599 = vmatpush3.msra.mxu0 %v1309_v30 }
 0x5bb   : > { %2600 = vmatprep.subr.mxu0 %v2765_v8 }
 0x5bc   : > { %2601 = vmatpush3.msra.mxu0 %v1308_v31 }
 0x5bd   : > { %2602 = vmatprep.subr.mxu0 %v2765_v8 }
 0x5be   : > { %2603 = vmatpush3.msra.mxu0 %v1307_v32 }
 0x5bf   : > { %2604 = vmatprep.subr.mxu0 %v2765_v8 }
 0x5c0   : > { %2605 = vmatpush3.msra.mxu0 %v1306_v33 }
 0x5c1   : > { %2606 = vmatprep.subr.mxu0 %v2765_v8 }
 0x5c2   : > { %2607 = vmatpush3.msra.mxu0 %v1305_v34 }
 0x5c3   : > { %2608 = vmatprep.subr.mxu0 %v2765_v8 }
 0x5c4   : > { %2609 = vmatpush3.msra.mxu0 %v1304_v35 }
 0x5c5   : > { %2610 = vmatprep.subr.mxu0 %v2765_v8 }
 0x5c6   : > { %2611 = vmatpush3.msra.mxu0 %v1303_v36 }
 0x5c7   : > { %2636 = vmatprep.subr.mxu0 %v2765_v8 }
 0x677   : > { %v1180_v4 = vpop.f32.mrf.mxu0 }
 0x678   : > { %v1181_v5 = vadd.f32 %v2409_v3, %v1180_v4  ;;  %v2418_v3 = vld [vmem:[%s3282_s15] ss:$0 sm:$0xff] }
 0x679   : > { %v2584_v6 = vpop.f32.mrf.mxu0 }
 0x67a   : > { %v1184_v7 = vadd.f32 %v1181_v5, %v2922_v20  ;;  %v2424_v6 = vld [vmem:[%s3272_s5 + $0x1] ss:$0 sm:$0xff] }
 0x67c   : > { %v1187_v9 = vsel %vm640_vm0, %v1184_v7, 0.0 }
 0x67d   : > { %1188 = vadd.xlane.f32.xlu1 %v1187_v9 }
 0x706   : > { %v1189_v10 = vpop.xlane.xlu1 %1188 }
 0x707   : > { %v1190_v11 = vmul.f32 0.03125, %v1189_v10 }
 0x709   : > { %v1191_v12 = vsub.f32 %v1184_v7, %v1190_v11 }
 0x70b   : > { %v1192_v13 = vmul.f32 %v1191_v12, %v1191_v12 }
 0x70d   : > { %v1193_v14 = vsel %vm640_vm0, %v1192_v13, 0.0 }
 0x70e   : > { %1194 = vadd.xlane.f32.xlu0 %v1193_v14 }
 0x797   : > { %v1195_v19 = vpop.xlane.xlu0 %1194 }
 0x798   : > { %v1196_v20 = vmul.f32 0.03125, %v1195_v19 }
 0x79a   : > { %v1197_v21 = vadd.f32 1e-12, %v1196_v20 }
 0x79c   : > { %2735 = vrsqrt.f32 %v1197_v21 }
 0x7a9   : > { %v2736_v22 = vpop.eup %2735 }
 0x7aa   : > { %v1199_v24 = vmul.f32 %v2736_v22, %v1191_v12 }
 0x7ac   : > { %v1206_v26 = vmul.f32 %v2411_v23, %v1199_v24 }
 0x7ae   : > { %v1213_v27 = vadd.f32 %v2412_v25, %v1206_v26 }
 0x7b0   : > { %2594 = vmatmul.mubr.msk.f32.vlgmr.msra.gmra.mxu1 %vm640_vm0, %v1213_v27 }
 0x7b1   : > { %2623 = vmatprep.mubr.msk.f32.mxu1 %vm2766_vm1, %v2765_v8  ;;  %2616 = vmatpush3.msra.mxu1 %v2422_v57 }
 0x7b2   : > { %2617 = vmatprep.subr.mxu1 %v2765_v8 }
 0x7b3   : > { %2618 = vmatpush3.msra.mxu1 %v2421_v58 }
 0x7b4   : > { %2619 = vmatprep.subr.mxu1 %v2765_v8 }
 0x7b5   : > { %2620 = vmatpush3.msra.mxu1 %v2420_v59 }
 0x7b6   : > { %2621 = vmatprep.subr.mxu1 %v2765_v8 }
 0x7b7   : > { %2622 = vmatpush3.msra.mxu1 %v2419_v60 }
 0x7b8   : > { %2626 = vmatprep.subr.mxu1 %v2765_v8 }
 0x870   : > { %v1294_v38 = vpop.f32.mrf.mxu1 }
 0x871   : > { %v1295_v39 = vadd.f32 %v2413_v37, %v1294_v38 }
 0x872   : > { %v2595_v40 = vpop.f32.mrf.mxu1 }
 0x873   : > { %v1299_v41 = vmul.f32 0.70710677, %v1295_v39  ;;  %v1298_v43 = vmul.f32 0.5, %v1295_v39 }
 0x875   : > { %2737 = verf.f32 %v1299_v41 }
 0x882   : > { %v2738_v42 = vpop.eup %2737 }
 0x883   : > { %v1301_v44 = vadd.f32 1.0, %v2738_v42  ;;  %v2435_v42 = vld [vmem:[%s3273_s6 + $0x38] sm:$0xff] }
 0x885   : > { %v1302_v45 = vmul.f32 %v1301_v44, %v1298_v43  ;;  %v2434_v43 = vld [vmem:[%s3273_s6 + $0x30] sm:$0xff]  ;;  %v2433_v44 = vld [vmem:[%s3273_s6 + $0x28] sm:$0xff] }
 0x887   : > { %2613 = vmatmul.mubr.msk.f32.vlgmr.msra.gmra.mxu0 %vm1318_vm4, %v1302_v45  ;;  %v2432_v45 = vld [vmem:[%s3273_s6 + $0x20] sm:$0xff] }
 0x888   : > { %2638 = vmatprep.mubr.msk.f32.mxu0 %vm2766_vm1, %v2765_v8 }
 0x947   : > { %v1388_v47 = vpop.f32.mrf.mxu0 }
 0x948   : > { %v1389_v48 = vadd.f32 %v2415_v46, %v1388_v47 }
 0x949   : > { %v2614_v49 = vpop.f32.mrf.mxu0 }
 0x94a   : > { %v1392_v50 = vadd.f32 %v1389_v48, %v1213_v27 }
 0x94c   : > { %v1395_v51 = vsel %vm640_vm0, %v1392_v50, 0.0 }
 0x94d   : > { %1396 = vadd.xlane.f32.xlu1 %v1395_v51 }
 0x9d6   : > { %v1397_v52 = vpop.xlane.xlu1 %1396 }
 0x9d7   : > { %v1398_v53 = vmul.f32 0.03125, %v1397_v52  ;;  %v2437_v52 = vld [vmem:[%s3274_s7 + $0x1] ss:$0 sm:$0xff] }
 0x9d9   : > { %v1399_v54 = vsub.f32 %v1392_v50, %v1398_v53 }
 0x9db   : > { %v1400_v55 = vmul.f32 %v1399_v54, %v1399_v54 }
 0x9dd   : > { %v1401_v56 = vsel %vm640_vm0, %v1400_v55, 0.0 }
 0x9de   : > { %1402 = vadd.xlane.f32.xlu1 %v1401_v56 }
 0xa67   : > { %v1403_v61 = vpop.xlane.xlu1 %1402 }
 0xa68   : > { %v1404_v62 = vmul.f32 0.03125, %v1403_v61 }
 0xa6a   : > { %v1405_v63 = vadd.f32 1e-12, %v1404_v62 }
 0xa6c   : > { %2739 = vrsqrt.f32 %v1405_v63  ;;  %v2446_v63 = vld [vmem:[%s3277_s10 + $0x38] sm:$0xff] }
 0xa79   : > { %v2740_v0 = vpop.eup %2739 }
 0xa7a   : > { %v1407_v2 = vmul.f32 %v2740_v0, %v1399_v54  ;;  %v2445_v0 = vld [vmem:[%s3277_s10 + $0x30] sm:$0xff] }
 0xa7c   : > { %v1414_v4 = vmul.f32 %v2417_v1, %v1407_v2  ;;  %v2444_v1 = vld [vmem:[%s3277_s10 + $0x28] sm:$0xff]  ;;  %v2443_v2 = vld [vmem:[%s3277_s10 + $0x20] sm:$0xff] }
 0xa7e   : > { %v3083_v5 = vadd.f32 %v2418_v3, %v1414_v4 }
 0xa80   : > { %2624 = vmatmul.mubr.msk.f32.vlgmr.msra.gmra.mxu1 %vm640_vm0, %v3083_v5 }
 0xa81   : > { %2628 = vmatprep.mubr.msk.f32.mxu1 %vm2766_vm1, %v2765_v8 }
 0xb40   : > { %v1504_v7 = vpop.f32.mrf.mxu1 }
 0xb41   : > { %v1505_v9 = vadd.f32 %v2424_v6, %v1504_v7  ;;  %v2441_v7 = vld [vmem:[%s3275_s8 + $0x1] ss:$0 sm:$0xff] }
 0xb42   : > { %v2625_v10 = vpop.f32.mrf.mxu1 }
 0xb43   : > { %1676 = vrot.lane.b32.xlu1 %v1505_v9, %s2769_s21  ;;  %1509 = vrot.lane.b32.xlu0 %v1505_v9, %s2768_s0  ;;  %v2442_v10 = vld [vmem:[%s3276_s9 + $0x1] ss:$0 sm:$0xff] }
 0xb47   : > { %1674 = vrot.lane.b32.xlu1 %v1505_v9, %s2767_s30  ;;  %s3301_s30 = smov 48  }
 0xbb5   : > { %v1677_v11 = vpop.permute.xlu1 %1676  ;;  %v1510_v12 = vpop.permute.xlu0 %1509 }
 0xbb6   : > { %2627 = vmatpush3.xpose.msk.msra.mxu1 %vm757_vm2, %v1510_v12  ;;  %2637 = vmatpush3.xpose.msk.msra.mxu0 %vm757_vm2, %v1677_v11 }
 0xbb7   : > { %2631 = vmatprep.subr.mxu1 %v2765_v8  ;;  %2646 = vmatprep.subr.mxu0 %v2765_v8 }
 0xbb9   : > { %v1675_v13 = vpop.permute.xlu1 %1674  ;;  %2629 = vmatmul.mubr.msk.f32.vlgmr.msra.gmra.mxu1 %vm757_vm2, %v1505_v9 }
 0xbba   : > { %2639 = vmatmul.mubr.msk.f32.vlgmr.msra.gmra.mxu0 %vm757_vm2, %v1675_v13  ;;  %2633 = vmatprep.mubr.msk.f32.mxu1 %vm2766_vm1, %v2765_v8  ;;  %v2457_v13 = vld [vmem:[%s3279_s12 + $0x78] sm:$0xff] }
 0xbbb   : > { %2654 = vmatprep.mubr.msk.f32.mxu0 %vm2766_vm1, %v2765_v8  ;;  %2647 = vmatpush3.msra.mxu0 %v2435_v42  ;;  %v2179_v42 = vld [vmem:[%s3283_s16 + $0x10] sm:$0xff] }
 0xbbc   : > { %2648 = vmatprep.subr.mxu0 %v2765_v8 }
 0xbbd   : > { %2649 = vmatpush3.msra.mxu0 %v2434_v43  ;;  %v2178_v43 = vld [vmem:[%s3283_s16 + $0x8] sm:$0xff] }
 0xbbe   : > { %2650 = vmatprep.subr.mxu0 %v2765_v8 }
 0xbbf   : > { %2651 = vmatpush3.msra.mxu0 %v2433_v44  ;;  %v2177_v44 = vld [vmem:[%s3283_s16] sm:$0xff] }
 0xbc0   : > { %2652 = vmatprep.subr.mxu0 %v2765_v8 }
 0xbc1   : > { %2653 = vmatpush3.msra.mxu0 %v2432_v45 }
 0xbc2   : > { %2668 = vmatprep.subr.mxu0 %v2765_v8 }
 0xc79   : > { %v1581_v14 = vpop.f32.mrf.mxu1 }
 0xc7a   : > { %v1585_v15 = vmul.f32 0.25, %v1581_v14  ;;  %v1748_v16 = vpop.f32.mrf.mxu0  ;;  %v2456_v14 = vld [vmem:[%s3279_s12 + $0x70] sm:$0xff] }
 0xc7b   : > { %v1752_v17 = vmul.f32 0.25, %v1748_v16  ;;  %v2630_v18 = vpop.f32.mrf.mxu1  ;;  %v2454_v16 = vld [vmem:[%s3279_s12 + $0x60] sm:$0xff] }
 0xc7c   : > { %v2640_v19 = vpop.f32.mrf.mxu0  ;;  %v1586_v20 = vadd.f32 %v2948_v29, %v1585_v15  ;;  %v2455_v15 = vld [vmem:[%s3279_s12 + $0x68] sm:$0xff]  ;;  %v2452_v18 = vld [vmem:[%s3279_s12 + $0x50] sm:$0xff] }
 0xc7d   : > { %v1753_v21 = vadd.f32 %v2948_v29, %v1752_v17  ;;  %v2453_v17 = vld [vmem:[%s3279_s12 + $0x58] sm:$0xff]  ;;  %v2451_v19 = vld [vmem:[%s3279_s12 + $0x48] sm:$0xff] }
 0xc7e   : > { %v1587_v22 = vsel %vm840_vm3, %v1586_v20, -inf }
 0xc7f   : > { %1588 = vmax.xlane.f32.xlu0 %v1587_v22  ;;  %v1754_v23 = vsel %vm840_vm3, %v1753_v21, -inf }
 0xc80   : > { %1755 = vmax.xlane.f32.xlu1 %v1754_v23 }
 0xc91   : > { %1598 = vrot.lane.b32.xlu1 %v1505_v9, %s2771_s26 }
 0xd08   : > { %v1589_v24 = vpop.xlane.xlu0 %1588 }
 0xd09   : > { %v1590_v25 = vsub.f32 %v1586_v20, %v1589_v24  ;;  %v1756_v26 = vpop.xlane.xlu1 %1755  ;;  %v2450_v20 = vld [vmem:[%s3279_s12 + $0x40] sm:$0xff] }
 0xd0a   : > { %v1757_v27 = vsub.f32 %v1753_v21, %v1756_v26  ;;  %v2448_v21 = vld [vmem:[%s3278_s11 + $0x1] ss:$0 sm:$0xff] }
 0xd0b   : > { %v1591_v28 = vmul.f32 1.442695, %v1590_v25 }
 0xd0c   : > { %v1758_v30 = vmul.f32 1.442695, %v1757_v27 }
 0xd0d   : > { %2741 = vpow2.f32 %v1591_v28  ;;  %v1599_v31 = vpop.permute.xlu1 %1598 }
 0xd0e   : > { %2632 = vmatpush3.msra.mxu1 %v1599_v31  ;;  %2743 = vpow2.f32 %v1758_v30  ;;  %v2459_v31 = vld [vmem:[%s3280_s13 + $0x1] ss:$0 sm:$0xff] }
 0xd0f   : > { %2641 = vmatprep.subr.mxu1 %v2765_v8 }
 0xd1a   : > { %v2742_v29 = vpop.eup %2741 }
 0xd1b   : > { %v1593_v32 = vsel %vm840_vm3, %v2742_v29, 0.0  ;;  %v2744_v33 = vpop.eup %2743 }
 0xd1c   : > { %1594 = vadd.xlane.f32.xlu0 %v1593_v32  ;;  %v1760_v34 = vsel %vm840_vm3, %v2744_v33, 0.0 }
 0xd20   : > { %1761 = vadd.xlane.f32.xlu0 %v1760_v34 }
 0xd36   : > { %1765 = vrot.lane.b32.xlu0 %v1505_v9, %s3301_s30 }
 0xda5   : > { %v1595_v35 = vpop.xlane.xlu0 %1594 }
 0xda6   : > { %2745 = vrcp.f32 %v1595_v35 }
 0xda9   : > { %v1762_v36 = vpop.xlane.xlu0 %1761 }
 0xdaa   : > { %2747 = vrcp.f32 %v1762_v36 }
 0xdad   : > { %v1766_v39 = vpop.permute.xlu0 %1765 }
 0xdb3   : > { %v2746_v37 = vpop.eup %2745 }
 0xdb4   : > { %v1597_v38 = vmul.f32 %v2746_v37, %v2742_v29 }
 0xdb6   : > { %2634 = vmatmul.mubr.msk.f32.vlgmr.msra.gmra.mxu1 %vm840_vm3, %v1597_v38 }
 0xdb7   : > { %v2748_v40 = vpop.eup %2747  ;;  %2642 = vmatpush3.msra.mxu1 %v1766_v39  ;;  %2643 = vmatprep.mubr.msk.f32.mxu1 %vm2766_vm1, %v2765_v8 }
 0xdb8   : > { %v1764_v41 = vmul.f32 %v2748_v40, %v2744_v33  ;;  %2657 = vmatprep.subr.mxu1 %v2765_v8 }
 0xdba   : > { %2644 = vmatmul.mubr.msk.f32.vlgmr.msra.gmra.mxu1 %vm840_vm3, %v1764_v41  ;;  %v2180_v41 = vld [vmem:[%s3283_s16 + $0x18] sm:$0xff] }
 0xdbb   : > { %2665 = vmatprep.mubr.msk.f32.mxu1 %vm2766_vm1, %v2765_v8  ;;  %2658 = vmatpush3.msra.mxu1 %v2446_v63  ;;  %v2260_v63 = vld [vmem:[%s3286_s19] sm:$0x1] }
 0xdbc   : > { %2659 = vmatprep.subr.mxu1 %v2765_v8 }
 0xdbd   : > { %2660 = vmatpush3.msra.mxu1 %v2445_v0 }
 0xdbe   : > { %2661 = vmatprep.subr.mxu1 %v2765_v8 }
 0xdbf   : > { %2662 = vmatpush3.msra.mxu1 %v2444_v1 }
 0xdc0   : > { %2663 = vmatprep.subr.mxu1 %v2765_v8 }
 0xdc1   : > { %2664 = vmatpush3.msra.mxu1 %v2443_v2 }
 0xdc2   : > { %2687 = vmatprep.subr.mxu1 %v2765_v8 }
 0xe76   : > { %v1670_v46 = vpop.f32.mrf.mxu1 }
 0xe78   : > { %v2635_v47 = vpop.f32.mrf.mxu1 }
 0xe7a   : > { %v1837_v48 = vpop.f32.mrf.mxu1 }
 0xe7b   : > { %1842 = vrot.lane.b32.xlu1 %v1837_v48, %s3302_s27 }
 0xe7c   : > { %v2645_v49 = vpop.f32.mrf.mxu1 }
 0xe7d   : > { %v2463_v49 = vld [vmem:[%s3281_s14 + $0x1] ss:$0 sm:$0xff] }
 0xeed   : > { %v1843_v50 = vpop.permute.xlu1 %1842 }
 0xeee   : > { %v1845_v51 = vsel %vm757_vm2, %v1670_v46, %v1843_v50 }
 0xeef   : > { %2655 = vmatmul.mubr.msk.f32.vlgmr.msra.gmra.mxu0 %vm640_vm0, %v1845_v51  ;;  %v2464_v51 = vld [vmem:[%s3282_s15 + $0x1] ss:$0 sm:$0xff] }
 0xef0   : > { %2684 = vmatprep.mubr.msk.f32.mxu0 %vm2766_vm1, %v2765_v8  ;;  %2669 = vmatpush3.msra.mxu0 %v2457_v13 }
 0xef1   : > { %2670 = vmatprep.subr.mxu0 %v2765_v8 }
 0xef2   : > { %2671 = vmatpush3.msra.mxu0 %v2456_v14 }
 0xef3   : > { %2672 = vmatprep.subr.mxu0 %v2765_v8 }
 0xef4   : > { %2673 = vmatpush3.msra.mxu0 %v2455_v15 }
 0xef5   : > { %2674 = vmatprep.subr.mxu0 %v2765_v8 }
 0xef6   : > { %2675 = vmatpush3.msra.mxu0 %v2454_v16 }
 0xef7   : > { %2676 = vmatprep.subr.mxu0 %v2765_v8 }
 0xef8   : > { %2677 = vmatpush3.msra.mxu0 %v2453_v17 }
 0xef9   : > { %2678 = vmatprep.subr.mxu0 %v2765_v8 }
 0xefa   : > { %2679 = vmatpush3.msra.mxu0 %v2452_v18 }
 0xefb   : > { %2680 = vmatprep.subr.mxu0 %v2765_v8 }
 0xefc   : > { %2681 = vmatpush3.msra.mxu0 %v2451_v19 }
 0xefd   : > { %2682 = vmatprep.subr.mxu0 %v2765_v8 }
 0xefe   : > { %2683 = vmatpush3.msra.mxu0 %v2450_v20 }
 0xfaf   : > { %v1928_v53 = vpop.f32.mrf.mxu0 }
 0xfb0   : > { %v1929_v54 = vadd.f32 %v2437_v52, %v1928_v53 }
 0xfb1   : > { %v2656_v55 = vpop.f32.mrf.mxu0 }
 0xfb2   : > { %v1932_v56 = vadd.f32 %v1929_v54, %v3083_v5  ;;  %v2259_v54 = vld [vmem:[%s3285_s18 + $0x18] sm:$0xff]  ;;  %v2258_v55 = vld [vmem:[%s3285_s18 + $0x10] sm:$0xff] }
 0xfb4   : > { %v1937_v57 = vsel %vm640_vm0, %v1932_v56, 0.0 }
 0xfb5   : > { %1938 = vadd.xlane.f32.xlu1 %v1937_v57  ;;  %v2256_v57 = vld [vmem:[%s3285_s18] sm:$0xff] }
0x103e   : > { %v1939_v58 = vpop.xlane.xlu1 %1938 }
0x103f   : > { %v1940_v59 = vmul.f32 0.03125, %v1939_v58  ;;  %v2181_v58 = vld [vmem:[%s3284_s17] sm:$0x1] }
0x1041   : > { %v1941_v60 = vsub.f32 %v1932_v56, %v1940_v59  ;;  %v2257_v56 = vld [vmem:[%s3285_s18 + $0x8] sm:$0xff] }
0x1043   : > { %v1942_v61 = vmul.f32 %v1941_v60, %v1941_v60 }
0x1045   : > { %v1943_v62 = vsel %vm640_vm0, %v1942_v61, 0.0 }
0x1046   : > { %1944 = vadd.xlane.f32.xlu0 %v1943_v62 }
0x10cf   : > { %v1945_v3 = vpop.xlane.xlu0 %1944 }
0x10d0   : > { %v1946_v4 = vmul.f32 0.03125, %v1945_v3 }
0x10d2   : > { %v1947_v5 = vadd.f32 1e-12, %v1946_v4 }
0x10d4   : > { %2749 = vrsqrt.f32 %v1947_v5 }
0x10e1   : > { %v2750_v6 = vpop.eup %2749 }
0x10e2   : > { %v1949_v9 = vmul.f32 %v2750_v6, %v1941_v60 }
0x10e4   : > { %v1956_v11 = vmul.f32 %v2441_v7, %v1949_v9 }
0x10e6   : > { %v1963_v12 = vadd.f32 %v2442_v10, %v1956_v11 }
0x10e8   : > { %2666 = vmatmul.mubr.msk.f32.vlgmr.msra.gmra.mxu1 %vm640_vm0, %v1963_v12 }
0x10e9   : > { %2695 = vmatprep.mubr.msk.f32.mxu1 %vm2766_vm1, %v2765_v8  ;;  %2688 = vmatpush3.msra.mxu1 %v2180_v41 }
0x10ea   : > { %2689 = vmatprep.subr.mxu1 %v2765_v8 }
0x10eb   : > { %2690 = vmatpush3.msra.mxu1 %v2179_v42 }
0x10ec   : > { %2691 = vmatprep.subr.mxu1 %v2765_v8 }
0x10ed   : > { %2692 = vmatpush3.msra.mxu1 %v2178_v43 }
0x10ee   : > { %2693 = vmatprep.subr.mxu1 %v2765_v8 }
0x10ef   : > { %2694 = vmatpush3.msra.mxu1 %v2177_v44 }
0x10f0   : > { %2698 = vmatprep.subr.mxu1 %v2765_v8 }
0x11a8   : > { %v2046_v22 = vpop.f32.mrf.mxu1 }
0x11a9   : > { %v2047_v23 = vadd.f32 %v2448_v21, %v2046_v22 }
0x11aa   : > { %v2667_v24 = vpop.f32.mrf.mxu1 }
0x11ab   : > { %v2051_v25 = vmul.f32 0.70710677, %v2047_v23  ;;  %v2050_v27 = vmul.f32 0.5, %v2047_v23 }
0x11ad   : > { %2751 = verf.f32 %v2051_v25 }
0x11ba   : > { %v2752_v26 = vpop.eup %2751 }
0x11bb   : > { %v2053_v28 = vadd.f32 1.0, %v2752_v26 }
0x11bd   : > { %v2054_v30 = vmul.f32 %v2053_v28, %v2050_v27 }
0x11bf   : > { %2685 = vmatmul.mubr.msk.f32.vlgmr.msra.gmra.mxu0 %vm1318_vm4, %v2054_v30 }
0x127f   : > { %v2141_v29 = vpop.f32.mrf.mxu0 }
0x1280   : > { %v2142_v32 = vadd.f32 %v2459_v31, %v2141_v29 }
0x1281   : > { %v2686_v33 = vpop.f32.mrf.mxu0 }
0x1282   : > { %v2145_v34 = vadd.f32 %v2142_v32, %v1963_v12 }
0x1284   : > { %v2150_v35 = vsel %vm640_vm0, %v2145_v34, 0.0 }
0x1285   : > { %2151 = vadd.xlane.f32.xlu0 %v2150_v35 }
0x130e   : > { %v2152_v36 = vpop.xlane.xlu0 %2151 }
0x130f   : > { %v2153_v37 = vmul.f32 0.03125, %v2152_v36 }
0x1311   : > { %v2154_v38 = vsub.f32 %v2145_v34, %v2153_v37 }
0x1313   : > { %v2155_v39 = vmul.f32 %v2154_v38, %v2154_v38 }
0x1315   : > { %v2156_v40 = vsel %vm640_vm0, %v2155_v39, 0.0 }
0x1316   : > { %2157 = vadd.xlane.f32.xlu1 %v2156_v40 }
0x139f   : > { %v2158_v45 = vpop.xlane.xlu1 %2157 }
0x13a0   : > { %v2159_v46 = vmul.f32 0.03125, %v2158_v45 }
0x13a2   : > { %v2160_v47 = vadd.f32 1e-12, %v2159_v46 }
0x13a4   : > { %2753 = vrsqrt.f32 %v2160_v47 }
0x13b1   : > { %v2754_v48 = vpop.eup %2753 }
0x13b2   : > { %v2162_v50 = vmul.f32 %v2754_v48, %v2154_v38 }
0x13b4   : > { %v2169_v52 = vmul.f32 %v2463_v49, %v2162_v50 }
0x13b6   : > { %v2176_v53 = vadd.f32 %v2464_v51, %v2169_v52 }
0x13b8   : > { %2696 = vmatmul.mubr.msk.f32.vlgmr.msra.gmra.mxu1 %vm640_vm0, %v2176_v53 }
0x13b9   : > { %2706 = vmatprep.mubr.msk.f32.mxu1 %vm2766_vm1, %v2765_v8  ;;  %2699 = vmatpush3.msra.mxu1 %v2259_v54 }
0x13ba   : > { %2700 = vmatprep.subr.mxu1 %v2765_v8 }
0x13bb   : > { %2701 = vmatpush3.msra.mxu1 %v2258_v55 }
0x13bc   : > { %2702 = vmatprep.subr.mxu1 %v2765_v8 }
0x13bd   : > { %2703 = vmatpush3.msra.mxu1 %v2257_v56 }
0x13be   : > { %2704 = vmatprep.subr.mxu1 %v2765_v8 }
0x13bf   : > { %2705 = vmatpush3.msra.mxu1 %v2256_v57 }
0x1478   : > { %v2251_v59 = vpop.f32.mrf.mxu1 }
0x1479   : > { %v2252_v60 = vadd.f32 %v2251_v59, %v2181_v58 }
0x147a   : > { %v2697_v61 = vpop.f32.mrf.mxu1 }
0x147b   : > { %2755 = vtanh.f32 %v2252_v60 }
0x1488   : > { %v2756_v62 = vpop.eup %2755 }
0x1489   : > { %2707 = vmatmul.mubr.msk.f32.vlgmr.msra.gmra.mxu1 %vm640_vm0, %v2756_v62 }
0x1549   : > { %v2330_v8 = vpop.f32.mrf.mxu1 }
0x154a   : > { %v2331_v0 = vadd.f32 %v2330_v8, %v2260_v63 }
0x154b   : > { %v2708_v1 = vpop.f32.mrf.mxu1 }
0x154c   : > { %2335 = vst.msk [vmem:[%s636_s3] sm:$0x1] %vm2334_vm5, %v2331_v0 }
0x154d PF: > { %s30_s1 = sadd.s32 1, %s2763_s1  }
0x154e   : > { %p27_p4 = scmp.ge.s32.totalorder %s30_s1, 4  }
0x1550   :  { %29 = sbr.rel (!%p27_p4) target bundleno = 6 (0x6), region = 145 }

</bundles_post_ra>
